<compile_context>
chip_gen: v5e
topology: v5e:2x2
jax: 0.10.0
libtpu: 0.0.40
codegen_flags: <defaults>
</compile_context>

<pallas_src>
import functools

import jax
import jax.numpy as jnp
from jax import lax
from jax.experimental import pallas as pl
from jax.experimental.pallas import tpu as pltpu


# ----------------------------------------------------------------------------
# Pallas kernel: in-kernel k*k gather + fused deep-K MXU matmuls + gate math
# ----------------------------------------------------------------------------
def convlstm_kernel(xh_ref, w_ref, b_ref, c_ref, *rest, W, k, TM, use_peephole):
    if use_peephole:
        wcif_ref, wco_ref, ch_ref, cc_ref, acc_ref = rest
    else:
        ch_ref, cc_ref, acc_ref = rest

    C = c_ref.shape[-1]
    p = (k - 1) // 2

    # First output row (within this image) produced by this stripe.  TM is a
    # whole number of image rows, so r0 is a multiple of W (and of 8).
    r0 = pl.multiple_of(pl.program_id(1) * TM, 8)

    masks = {}
    if k > 1:
        # Column index of each output row inside its image row. Stripe-invariant
        # because TM is a multiple of W.
        col = lax.broadcasted_iota(jnp.int32, (TM, 1), 0) % W

        def edge_mask(d):
            if d not in masks:
                cd = col + d
                masks[d] = (cd >= 0) & (cd < W)
            return masks[d]

    # Accumulate the k*k shifted-view matmuls into the f32 VMEM scratch.  Each
    # tap is a (TM, Cin+C) @ (Cin+C, 4C) bf16 MXU matmul, f32 accumulation;
    # the x and h paths stay fused in one operand / one weight slab.
    for dy in range(k):
        for dx in range(k):
            t = dy * k + dx
            patch = xh_ref[0, pl.ds(r0 + dy * W + dx, TM), :]
            patch = patch.astype(jnp.bfloat16)
            d = dx - p
            if d != 0:
                # Taps that stepped over a W-boundary picked up a neighbouring
                # image row; zero those rows before they reach the MXU.
                patch = jnp.where(edge_mask(d), patch, 0)
            contrib = jnp.dot(patch, w_ref[t],
                              preferred_element_type=jnp.float32)
            if t == 0:
                acc_ref[...] = contrib
            else:
                acc_ref[...] += contrib

    g = acc_ref[...] + b_ref[...]            # gates packed as [ i | f | o | c ]
    c = c_ref[...]

    if use_peephole:
        s_if = jax.nn.sigmoid(
            g[:, :2 * C] + jnp.concatenate([c, c], axis=-1) * wcif_ref[...])
        ci = s_if[:, :C]
        cf = s_if[:, C:]
        cc = cf * c + ci * jnp.tanh(g[:, 3 * C:])
        co = jax.nn.sigmoid(g[:, 2 * C:3 * C] + cc * wco_ref[...])
    else:
        s_ifo = jax.nn.sigmoid(g[:, :3 * C])   # one wide sigmoid over i, f, o
        ci = s_ifo[:, :C]
        cf = s_ifo[:, C:2 * C]
        co = s_ifo[:, 2 * C:3 * C]
        cc = cf * c + ci * jnp.tanh(g[:, 3 * C:])

    ch_ref[...] = (co * jnp.tanh(cc)).astype(ch_ref.dtype)
    cc_ref[...] = cc


# ----------------------------------------------------------------------------
# Layout helpers (run in XLA, outside the kernel)
# ----------------------------------------------------------------------------
def _flatten_pad_rows(t_nhwc, p):
    """(B,H,W,C) -> (B, (H+2p)*W + 2p, C): pad H, flatten HW, pad flat ends."""
    B, H, W, C = t_nhwc.shape
    tp = jnp.pad(t_nhwc, ((0, 0), (p, p), (0, 0), (0, 0)))
    flat = tp.reshape(B, (H + 2 * p) * W, C)
    if p:
        flat = jnp.pad(flat, ((0, 0), (p, p), (0, 0)))
    return flat


def _pick_stripe_rows(H, W, row_target):
    """Rows-per-stripe TH: divides H; TH*W a multiple of 16 (bf16) if possible."""
    cands = [th for th in range(1, H + 1)
             if H % th == 0 and (th * W) % 16 == 0]
    if not cands:
        cands = [th for th in range(1, H + 1)
                 if H % th == 0 and (th * W) % 8 == 0]
    if not cands:
        raise ValueError(f"H*W must be a multiple of 8 (got H={H}, W={W})")
    small = [th for th in cands if th * W <= row_target]
    return max(small) if small else min(cands)


# ----------------------------------------------------------------------------
# Jitted step functions
# ----------------------------------------------------------------------------
def _convlstm_step_nhwc(x_nhwc, h_nhwc, c_nhwc, w_taps, bias, wcif, wco,
                        *, k, use_peephole, row_target):
    B, H, W, Cin = x_nhwc.shape
    C = c_nhwc.shape[-1]
    p = (k - 1) // 2
    CK = Cin + C
    M = B * H * W
    Lp = (H + 2 * p) * W + 2 * p

    # Fused [x | h] operand, H-padded and row-flattened (one cheap XLA pass;
    # no im2col).  Kept f32 -> cast to bf16 per tap inside the kernel.
    xh = jnp.concatenate([x_nhwc.astype(jnp.float32),
                          h_nhwc.astype(jnp.float32)], axis=-1)
    xh_flat = _flatten_pad_rows(xh, p)                     # (B, Lp, CK) f32
    c_flat = c_nhwc.astype(jnp.float32).reshape(M, C)

    TH = _pick_stripe_rows(H, W, row_target)
    TM = TH * W
    n_s = H // TH
    ch_dtype = jnp.bfloat16 if TM % 16 == 0 else jnp.float32

    row_spec = pl.BlockSpec((TM, C), lambda b, s: (b * n_s + s, 0))
    in_specs = [
        pl.BlockSpec((1, Lp, CK), lambda b, s: (b, 0, 0)),           # resident image
        pl.BlockSpec((k * k, CK, 4 * C), lambda b, s: (0, 0, 0)),    # resident weights
        pl.BlockSpec((1, 4 * C), lambda b, s: (0, 0)),               # resident bias
        row_spec,                                                    # c, stripe tile
    ]
    operands = [xh_flat, w_taps, bias, c_flat]
    if use_peephole:
        in_specs += [pl.BlockSpec((TM, 2 * C), lambda b, s: (s, 0)),   # Wci|Wcf
                     pl.BlockSpec((TM, C), lambda b, s: (s, 0))]       # Wco
        operands += [wcif, wco]

    kernel = functools.partial(convlstm_kernel, W=W, k=k, TM=TM,
                               use_peephole=use_peephole)

    ch_flat, cc_flat = pl.pallas_call(
        kernel,
        out_shape=(jax.ShapeDtypeStruct((M, C), ch_dtype),
                   jax.ShapeDtypeStruct((M, C), jnp.float32)),
        grid=(B, n_s),
        in_specs=in_specs,
        out_specs=(row_spec, row_spec),
        scratch_shapes=[pltpu.VMEM((TM, 4 * C), jnp.float32)],
        input_output_aliases={3: 1},            # donate c buffer to cc output
        compiler_params=pltpu.CompilerParams(
            dimension_semantics=("parallel", "parallel")),
    )(*operands)

    return ch_flat.reshape(B, H, W, C), cc_flat.reshape(B, H, W, C)


convlstm_step_nhwc = jax.jit(
    _convlstm_step_nhwc, static_argnames=("k", "use_peephole", "row_target"))


@functools.partial(jax.jit, static_argnames=("k", "use_peephole", "row_target"))
def convlstm_step_nchw(x, h, c, w_taps, bias, wcif, wco,
                       *, k, use_peephole, row_target):
    to_nhwc = lambda t: jnp.transpose(t, (0, 2, 3, 1))
    ch, cc = _convlstm_step_nhwc(
        to_nhwc(x), to_nhwc(h), to_nhwc(c), w_taps, bias, wcif, wco,
        k=k, use_peephole=use_peephole, row_target=row_target)
    to_nchw = lambda t: jnp.transpose(t, (0, 3, 1, 2))
    return to_nchw(ch.astype(jnp.float32)), to_nchw(cc)


# ----------------------------------------------------------------------------
# Cell wrapper (mirrors torchbeast ConvLSTMCell.forward)
# ----------------------------------------------------------------------------
class ConvLSTMCellPallas:
    def __init__(self, input_channels, hidden_channels, kernel_size, key,
                 row_target=64):
        assert hidden_channels % 2 == 0
        assert kernel_size % 2 == 1, "kernel_size must be odd ('same' padding)"
        self.cin = input_channels
        self.chid = hidden_channels
        self.k = kernel_size
        self.row_target = row_target

        keys = jax.random.split(key, 12)
        kk = kernel_size * kernel_size
        C, Ci = hidden_channels, input_channels

        def conv_w(k_, cout, cin):
            bound = 1.0 / jnp.sqrt(cin * kk)
            return jax.random.uniform(
                k_, (cout, cin, kernel_size, kernel_size),
                dtype=jnp.float32, minval=-bound, maxval=bound)

        def conv_b(k_, cout, cin):
            bound = 1.0 / jnp.sqrt(cin * kk)
            return jax.random.uniform(k_, (cout,), dtype=jnp.float32,
                                      minval=-bound, maxval=bound)

        # f32 conv weights kept for the reference / external inspection.
        self.Wxi = conv_w(keys[0], C, Ci); self.bxi = conv_b(keys[1], C, Ci)
        self.Wxf = conv_w(keys[2], C, Ci); self.bxf = conv_b(keys[3], C, Ci)
        self.Wxc = conv_w(keys[4], C, Ci); self.bxc = conv_b(keys[5], C, Ci)
        self.Wxo = conv_w(keys[6], C, Ci); self.bxo = conv_b(keys[7], C, Ci)
        self.Whi = conv_w(keys[8], C, C)
        self.Whf = conv_w(keys[9], C, C)
        self.Whc = conv_w(keys[10], C, C)
        self.Who = conv_w(keys[11], C, C)

        # Packed per-tap matmul weights: (k*k, Cin+C, 4C), gate order i,f,o,c,
        # bf16 for the MXU (accumulation stays f32 in the kernel).
        def tap_mat(w_oihw):
            cin = w_oihw.shape[1]
            return jnp.transpose(w_oihw, (2, 3, 1, 0)).reshape(kk, cin, C)

        wx = jnp.concatenate(
            [tap_mat(w) for w in (self.Wxi, self.Wxf, self.Wxo, self.Wxc)],
            axis=-1)                                     # (kk, Cin, 4C)
        wh = jnp.concatenate(
            [tap_mat(w) for w in (self.Whi, self.Whf, self.Who, self.Whc)],
            axis=-1)                                     # (kk, C, 4C)
        self.w_taps = jnp.concatenate([wx, wh], axis=1).astype(jnp.bfloat16)
        self.bias = jnp.concatenate(
            [self.bxi, self.bxf, self.bxo, self.bxc]).reshape(1, 4 * C)

        # Peephole weights (lazily zero, matching torch initial_state()).
        self.Wcif = None       # (H*W, 2C): [Wci | Wcf]
        self.Wco = None        # (H*W, C)

    def set_peepholes(self, wci_nchw, wcf_nchw, wco_nchw):
        """Install learned peephole weights (PyTorch layout (1, C, H, W))."""
        def to_hwc(pw):
            _, C, H, W = pw.shape
            return jnp.transpose(pw[0], (1, 2, 0)).reshape(H * W, C)
        self.Wcif = jnp.concatenate(
            [to_hwc(wci_nchw), to_hwc(wcf_nchw)], axis=-1)
        self.Wco = to_hwc(wco_nchw)

    def forward(self, x, state):
        """NCHW in / NCHW out — matches the PyTorch module API."""
        h, c = state
        use_peep = self.Wcif is not None
        ch, cc = convlstm_step_nchw(
            x, h, c, self.w_taps, self.bias, self.Wcif, self.Wco,
            k=self.k, use_peephole=use_peep, row_target=self.row_target)
        return ch, (ch, cc)

    def forward_nhwc(self, x_nhwc, state_nhwc):
        """NHWC path: use inside a time loop (h stays bf16, no transposes)."""
        h, c = state_nhwc
        use_peep = self.Wcif is not None
        ch, cc = convlstm_step_nhwc(
            x_nhwc, h, c, self.w_taps, self.bias, self.Wcif, self.Wco,
            k=self.k, use_peephole=use_peep, row_target=self.row_target)
        return ch, (ch, cc)


# ----------------------------------------------------------------------------
# Plain-JAX reference (mirrors the PyTorch forward exactly) for validation.
# ----------------------------------------------------------------------------
def _conv_ref(x, w, b=None):
    out = jax.lax.conv_general_dilated(
        x, w, window_strides=(1, 1), padding="SAME",
        dimension_numbers=("NCHW", "OIHW", "NCHW"))
    if b is not None:
        out = out + b[None, :, None, None]
    return out


def reference_forward(cell, x, h, c, wci, wcf, wco):
    ci = jax.nn.sigmoid(_conv_ref(x, cell.Wxi, cell.bxi)
                        + _conv_ref(h, cell.Whi) + c * wci)
    cf = jax.nn.sigmoid(_conv_ref(x, cell.Wxf, cell.bxf)
                        + _conv_ref(h, cell.Whf) + c * wcf)
    cc = cf * c + ci * jnp.tanh(_conv_ref(x, cell.Wxc, cell.bxc)
                                + _conv_ref(h, cell.Whc))
    co = jax.nn.sigmoid(_conv_ref(x, cell.Wxo, cell.bxo)
                        + _conv_ref(h, cell.Who) + cc * wco)
    ch = co * jnp.tanh(cc)
    return ch, cc


# ----------------------------------------------------------------------------
if __name__ == "__main__":
    B, Cin, Chid, H, W, K = 2, 4, 32, 16, 16, 3

    root = jax.random.PRNGKey(0)
    k_x, k_h, k_c, k_params, k_peep = jax.random.split(root, 5)

    x = jax.random.normal(k_x, (B, Cin, H, W), dtype=jnp.float32)
    h0 = jax.random.normal(k_h, (B, Chid, H, W), dtype=jnp.float32)
    c0 = jax.random.normal(k_c, (B, Chid, H, W), dtype=jnp.float32)

    cell = ConvLSTMCellPallas(Cin, Chid, K, k_params)

    # --- step 1: module semantics (zero peepholes from initial_state) -------
    ch, (ch_state, cc_state) = cell.forward(x, (h0, c0))
    jax.block_until_ready((ch, ch_state, cc_state))

    zeros_peep = jnp.zeros((1, Chid, H, W), jnp.float32)
    ch_ref, cc_ref = reference_forward(cell, x, h0, c0,
                                       zeros_peep, zeros_peep, zeros_peep)
    # bf16 matmul operands / bf16 ch -> relaxed tolerance vs f32 reference.
    assert jnp.allclose(ch, ch_ref, atol=2e-2, rtol=2e-2), "ch mismatch (step 1)"
    assert jnp.allclose(cc_state, cc_ref, atol=2e-2, rtol=2e-2), "cc mismatch (step 1)"
    assert ch.shape == (B, Chid, H, W)

    # --- step 2: general (non-zero learned) peephole path -------------------
    kp1, kp2, kp3 = jax.random.split(k_peep, 3)
    wci = 0.1 * jax.random.normal(kp1, (1, Chid, H, W), dtype=jnp.float32)
    wcf = 0.1 * jax.random.normal(kp2, (1, Chid, H, W), dtype=jnp.float32)
    wco = 0.1 * jax.random.normal(kp3, (1, Chid, H, W), dtype=jnp.float32)
    cell.set_peepholes(wci, wcf, wco)

    ch2, (h2, c2) = cell.forward(x, (ch_ref, cc_ref))
    jax.block_until_ready((ch2, c2))
    ch2_ref, cc2_ref = reference_forward(cell, x, ch_ref, cc_ref, wci, wcf, wco)
    assert jnp.allclose(ch2, ch2_ref, atol=2e-2, rtol=2e-2), "ch mismatch (step 2)"
    assert jnp.allclose(c2, cc2_ref, atol=2e-2, rtol=2e-2), "cc mismatch (step 2)"

    # --- short NHWC time loop (preferred layout for recurrent use) ----------
    to_nhwc = lambda t: jnp.transpose(t, (0, 2, 3, 1))
    state = (to_nhwc(h0), to_nhwc(c0))
    x_nhwc = to_nhwc(x)
    for _ in range(3):
        out_nhwc, state = cell.forward_nhwc(x_nhwc, state)
    jax.block_until_ready(out_nhwc)
    assert out_nhwc.shape == (B, H, W, Chid)

    print("KERNEL_OK")
</pallas_src>

<mosaic_0001>
module attributes {stable_mosaic.version = 11 : i64} {
  func.func @convlstm_kernel(%arg0: i32, %arg1: i32, %arg2: memref<1x290x36xf32, #tpu.memory_space<vmem>>, %arg3: memref<9x36x128xbf16, #tpu.memory_space<vmem>>, %arg4: memref<1x128xf32, #tpu.memory_space<vmem>>, %arg5: memref<64x32xf32, #tpu.memory_space<vmem>>, %arg6: memref<64x32xbf16, #tpu.memory_space<vmem>>, %arg7: memref<64x32xf32, #tpu.memory_space<vmem>>, %arg8: memref<64x128xf32, #tpu.memory_space<vmem>>) attributes {dimension_semantics = [#tpu.dimension_semantics<parallel>, #tpu.dimension_semantics<parallel>], iteration_bounds = array<i64: 2, 4>, scalar_prefetch = 0 : i64, scratch_operands = 1 : i64, tpu.core_type = #tpu.core_type<tc>, window_params = [{transform_indices = @transform_0, window_bounds = array<i64: 1, 290, 36>}, {pipeline_mode = #tpu.pipeline_mode<synchronous>, transform_indices = @transform_1, window_bounds = array<i64: 9, 36, 128>}, {pipeline_mode = #tpu.pipeline_mode<synchronous>, transform_indices = @transform_2, window_bounds = array<i64: 1, 128>}, {transform_indices = @transform_3, window_bounds = array<i64: 64, 32>}, {transform_indices = @transform_4, window_bounds = array<i64: 64, 32>}, {transform_indices = @transform_5, window_bounds = array<i64: 64, 32>}]} {
    %c64_i32 = arith.constant 64 : i32
    %0 = arith.muli %arg1, %c64_i32 : i32
    %1 = tpu.assume_multiple %0, 8 : i32
    %2 = tpu.iota {dimensions = array<i32: 0>} : vector<64x1xi32>
    %c16_i32 = arith.constant 16 : i32
    %c0_i32 = arith.constant 0 : i32
    %3 = arith.cmpi eq, %c16_i32, %c0_i32 : i32
    %c1_i32 = arith.constant 1 : i32
    %4 = arith.select %3, %c1_i32, %c16_i32 : i32
    %5 = vector.broadcast %4 : i32 to vector<64x1xi32>
    %6 = arith.remsi %2, %5 : vector<64x1xi32>
    %c0_i32_0 = arith.constant 0 : i32
    %7 = vector.broadcast %c0_i32_0 : i32 to vector<64x1xi32>
    %8 = arith.cmpi ne, %6, %7 : vector<64x1xi32>
    %c0_i32_1 = arith.constant 0 : i32
    %9 = vector.broadcast %c0_i32_1 : i32 to vector<64x1xi32>
    %10 = arith.cmpi slt, %6, %9 : vector<64x1xi32>
    %c0_i32_2 = arith.constant 0 : i32
    %11 = arith.cmpi slt, %4, %c0_i32_2 : i32
    %12 = vector.broadcast %11 : i1 to vector<64x1xi1>
    %13 = vector.broadcast %12 : vector<64x1xi1> to vector<64x1xi1>
    %14 = arith.xori %10, %13 : vector<64x1xi1>
    %15 = arith.andi %14, %8 : vector<64x1xi1>
    %16 = vector.broadcast %4 : i32 to vector<64x1xi32>
    %17 = arith.addi %6, %16 : vector<64x1xi32>
    %18 = arith.select %15, %17, %6 : vector<64x1xi1>, vector<64x1xi32>
    %c0_i32_3 = arith.constant 0 : i32
    %19 = arith.addi %1, %c0_i32_3 : i32
    %c0_i32_4 = arith.constant 0 : i32
    %20 = arith.addi %19, %c0_i32_4 : i32
    %c0 = arith.constant 0 : index
    %21 = arith.index_cast %20 : i32 to index
    %c0_5 = arith.constant 0 : index
    %22 = vector.load %arg2[%c0, %21, %c0_5] : memref<1x290x36xf32, #tpu.memory_space<vmem>>, vector<1x64x36xf32>
    %23 = vector.shape_cast %22 : vector<1x64x36xf32> to vector<64x36xf32>
    %24 = arith.truncf %23 : vector<64x36xf32> to vector<64x36xbf16>
    %c-1_i32 = arith.constant -1 : i32
    %25 = vector.broadcast %c-1_i32 : i32 to vector<64x1xi32>
    %26 = arith.addi %18, %25 : vector<64x1xi32>
    %c0_i32_6 = arith.constant 0 : i32
    %27 = vector.broadcast %c0_i32_6 : i32 to vector<64x1xi32>
    %28 = arith.cmpi sge, %26, %27 : vector<64x1xi32>
    %c16_i32_7 = arith.constant 16 : i32
    %29 = vector.broadcast %c16_i32_7 : i32 to vector<64x1xi32>
    %30 = arith.cmpi slt, %26, %29 : vector<64x1xi32>
    %31 = arith.andi %28, %30 : vector<64x1xi1>
    %c0_i32_8 = arith.constant 0 : i32
    %32 = arith.sitofp %c0_i32_8 : i32 to bf16
    %33 = vector.shape_cast %31 : vector<64x1xi1> to vector<64x1xi1>
    %34 = vector.broadcast %33 : vector<64x1xi1> to vector<64x36xi1>
    %35 = vector.broadcast %32 : bf16 to vector<64x36xbf16>
    %36 = arith.select %34, %24, %35 : vector<64x36xi1>, vector<64x36xbf16>
    %c0_9 = arith.constant 0 : index
    %c0_10 = arith.constant 0 : index
    %c0_11 = arith.constant 0 : index
    %37 = vector.load %arg3[%c0_9, %c0_10, %c0_11] : memref<9x36x128xbf16, #tpu.memory_space<vmem>>, vector<1x36x128xbf16>
    %38 = vector.shape_cast %37 : vector<1x36x128xbf16> to vector<36x128xbf16>
    %cst = arith.constant dense<0.000000e+00> : vector<64x128xf32>
    %39 = tpu.matmul %36, %38, %cst {dimension_numbers = #tpu.dot_dimension_numbers<[1], [0], [0], [1], [0, 0, 1, 1], [], []>} : vector<64x36xbf16>, vector<36x128xbf16>, vector<64x128xf32> -> vector<64x128xf32>
    %c0_12 = arith.constant 0 : index
    %c0_13 = arith.constant 0 : index
    %40 = vector.load %arg8[%c0_12, %c0_13] : memref<64x128xf32, #tpu.memory_space<vmem>>, vector<64x128xf32>
    tpu.vector_store %arg8[%c0_12, %c0_13], %39 {strides = array<i32>} : memref<64x128xf32, #tpu.memory_space<vmem>>, vector<64x128xf32>,
    %c0_i32_14 = arith.constant 0 : i32
    %41 = arith.addi %1, %c0_i32_14 : i32
    %c1_i32_15 = arith.constant 1 : i32
    %42 = arith.addi %41, %c1_i32_15 : i32
    %c0_16 = arith.constant 0 : index
    %43 = arith.index_cast %42 : i32 to index
    %c0_17 = arith.constant 0 : index
    %44 = vector.load %arg2[%c0_16, %43, %c0_17] : memref<1x290x36xf32, #tpu.memory_space<vmem>>, vector<1x64x36xf32>
    %45 = vector.shape_cast %44 : vector<1x64x36xf32> to vector<64x36xf32>
    %46 = arith.truncf %45 : vector<64x36xf32> to vector<64x36xbf16>
    %c1 = arith.constant 1 : index
    %c0_18 = arith.constant 0 : index
    %c0_19 = arith.constant 0 : index
    %47 = vector.load %arg3[%c1, %c0_18, %c0_19] : memref<9x36x128xbf16, #tpu.memory_space<vmem>>, vector<1x36x128xbf16>
    %48 = vector.shape_cast %47 : vector<1x36x128xbf16> to vector<36x128xbf16>
    %cst_20 = arith.constant dense<0.000000e+00> : vector<64x128xf32>
    %49 = tpu.matmul %46, %48, %cst_20 {dimension_numbers = #tpu.dot_dimension_numbers<[1], [0], [0], [1], [0, 0, 1, 1], [], []>} : vector<64x36xbf16>, vector<36x128xbf16>, vector<64x128xf32> -> vector<64x128xf32>
    %c0_21 = arith.constant 0 : index
    %c0_22 = arith.constant 0 : index
    %50 = vector.load %arg8[%c0_21, %c0_22] : memref<64x128xf32, #tpu.memory_space<vmem>>, vector<64x128xf32>
    %51 = arith.addf %50, %49 : vector<64x128xf32>
    %c0_23 = arith.constant 0 : index
    %c0_24 = arith.constant 0 : index
    %52 = vector.load %arg8[%c0_23, %c0_24] : memref<64x128xf32, #tpu.memory_space<vmem>>, vector<64x128xf32>
    tpu.vector_store %arg8[%c0_23, %c0_24], %51 {strides = array<i32>} : memref<64x128xf32, #tpu.memory_space<vmem>>, vector<64x128xf32>,
    %c0_i32_25 = arith.constant 0 : i32
    %53 = arith.addi %1, %c0_i32_25 : i32
    %c2_i32 = arith.constant 2 : i32
    %54 = arith.addi %53, %c2_i32 : i32
    %c0_26 = arith.constant 0 : index
    %55 = arith.index_cast %54 : i32 to index
    %c0_27 = arith.constant 0 : index
    %56 = vector.load %arg2[%c0_26, %55, %c0_27] : memref<1x290x36xf32, #tpu.memory_space<vmem>>, vector<1x64x36xf32>
    %57 = vector.shape_cast %56 : vector<1x64x36xf32> to vector<64x36xf32>
    %58 = arith.truncf %57 : vector<64x36xf32> to vector<64x36xbf16>
    %c1_i32_28 = arith.constant 1 : i32
    %59 = vector.broadcast %c1_i32_28 : i32 to vector<64x1xi32>
    %60 = arith.addi %18, %59 : vector<64x1xi32>
    %c0_i32_29 = arith.constant 0 : i32
    %61 = vector.broadcast %c0_i32_29 : i32 to vector<64x1xi32>
    %62 = arith.cmpi sge, %60, %61 : vector<64x1xi32>
    %c16_i32_30 = arith.constant 16 : i32
    %63 = vector.broadcast %c16_i32_30 : i32 to vector<64x1xi32>
    %64 = arith.cmpi slt, %60, %63 : vector<64x1xi32>
    %65 = arith.andi %62, %64 : vector<64x1xi1>
    %c0_i32_31 = arith.constant 0 : i32
    %66 = arith.sitofp %c0_i32_31 : i32 to bf16
    %67 = vector.shape_cast %65 : vector<64x1xi1> to vector<64x1xi1>
    %68 = vector.broadcast %67 : vector<64x1xi1> to vector<64x36xi1>
    %69 = vector.broadcast %66 : bf16 to vector<64x36xbf16>
    %70 = arith.select %68, %58, %69 : vector<64x36xi1>, vector<64x36xbf16>
    %c2 = arith.constant 2 : index
    %c0_32 = arith.constant 0 : index
    %c0_33 = arith.constant 0 : index
    %71 = vector.load %arg3[%c2, %c0_32, %c0_33] : memref<9x36x128xbf16, #tpu.memory_space<vmem>>, vector<1x36x128xbf16>
    %72 = vector.shape_cast %71 : vector<1x36x128xbf16> to vector<36x128xbf16>
    %cst_34 = arith.constant dense<0.000000e+00> : vector<64x128xf32>
    %73 = tpu.matmul %70, %72, %cst_34 {dimension_numbers = #tpu.dot_dimension_numbers<[1], [0], [0], [1], [0, 0, 1, 1], [], []>} : vector<64x36xbf16>, vector<36x128xbf16>, vector<64x128xf32> -> vector<64x128xf32>
    %c0_35 = arith.constant 0 : index
    %c0_36 = arith.constant 0 : index
    %74 = vector.load %arg8[%c0_35, %c0_36] : memref<64x128xf32, #tpu.memory_space<vmem>>, vector<64x128xf32>
    %75 = arith.addf %74, %73 : vector<64x128xf32>
    %c0_37 = arith.constant 0 : index
    %c0_38 = arith.constant 0 : index
    %76 = vector.load %arg8[%c0_37, %c0_38] : memref<64x128xf32, #tpu.memory_space<vmem>>, vector<64x128xf32>
    tpu.vector_store %arg8[%c0_37, %c0_38], %75 {strides = array<i32>} : memref<64x128xf32, #tpu.memory_space<vmem>>, vector<64x128xf32>,
    %c16_i32_39 = arith.constant 16 : i32
    %77 = arith.addi %1, %c16_i32_39 : i32
    %c0_i32_40 = arith.constant 0 : i32
    %78 = arith.addi %77, %c0_i32_40 : i32
    %c0_41 = arith.constant 0 : index
    %79 = arith.index_cast %78 : i32 to index
    %c0_42 = arith.constant 0 : index
    %80 = vector.load %arg2[%c0_41, %79, %c0_42] : memref<1x290x36xf32, #tpu.memory_space<vmem>>, vector<1x64x36xf32>
    %81 = vector.shape_cast %80 : vector<1x64x36xf32> to vector<64x36xf32>
    %82 = arith.truncf %81 : vector<64x36xf32> to vector<64x36xbf16>
    %c0_i32_43 = arith.constant 0 : i32
    %83 = arith.sitofp %c0_i32_43 : i32 to bf16
    %84 = vector.shape_cast %31 : vector<64x1xi1> to vector<64x1xi1>
    %85 = vector.broadcast %84 : vector<64x1xi1> to vector<64x36xi1>
    %86 = vector.broadcast %83 : bf16 to vector<64x36xbf16>
    %87 = arith.select %85, %82, %86 : vector<64x36xi1>, vector<64x36xbf16>
    %c3 = arith.constant 3 : index
    %c0_44 = arith.constant 0 : index
    %c0_45 = arith.constant 0 : index
    %88 = vector.load %arg3[%c3, %c0_44, %c0_45] : memref<9x36x128xbf16, #tpu.memory_space<vmem>>, vector<1x36x128xbf16>
    %89 = vector.shape_cast %88 : vector<1x36x128xbf16> to vector<36x128xbf16>
    %cst_46 = arith.constant dense<0.000000e+00> : vector<64x128xf32>
    %90 = tpu.matmul %87, %89, %cst_46 {dimension_numbers = #tpu.dot_dimension_numbers<[1], [0], [0], [1], [0, 0, 1, 1], [], []>} : vector<64x36xbf16>, vector<36x128xbf16>, vector<64x128xf32> -> vector<64x128xf32>
    %c0_47 = arith.constant 0 : index
    %c0_48 = arith.constant 0 : index
    %91 = vector.load %arg8[%c0_47, %c0_48] : memref<64x128xf32, #tpu.memory_space<vmem>>, vector<64x128xf32>
    %92 = arith.addf %91, %90 : vector<64x128xf32>
    %c0_49 = arith.constant 0 : index
    %c0_50 = arith.constant 0 : index
    %93 = vector.load %arg8[%c0_49, %c0_50] : memref<64x128xf32, #tpu.memory_space<vmem>>, vector<64x128xf32>
    tpu.vector_store %arg8[%c0_49, %c0_50], %92 {strides = array<i32>} : memref<64x128xf32, #tpu.memory_space<vmem>>, vector<64x128xf32>,
    %c16_i32_51 = arith.constant 16 : i32
    %94 = arith.addi %1, %c16_i32_51 : i32
    %c1_i32_52 = arith.constant 1 : i32
    %95 = arith.addi %94, %c1_i32_52 : i32
    %c0_53 = arith.constant 0 : index
    %96 = arith.index_cast %95 : i32 to index
    %c0_54 = arith.constant 0 : index
    %97 = vector.load %arg2[%c0_53, %96, %c0_54] : memref<1x290x36xf32, #tpu.memory_space<vmem>>, vector<1x64x36xf32>
    %98 = vector.shape_cast %97 : vector<1x64x36xf32> to vector<64x36xf32>
    %99 = arith.truncf %98 : vector<64x36xf32> to vector<64x36xbf16>
    %c4 = arith.constant 4 : index
    %c0_55 = arith.constant 0 : index
    %c0_56 = arith.constant 0 : index
    %100 = vector.load %arg3[%c4, %c0_55, %c0_56] : memref<9x36x128xbf16, #tpu.memory_space<vmem>>, vector<1x36x128xbf16>
    %101 = vector.shape_cast %100 : vector<1x36x128xbf16> to vector<36x128xbf16>
    %cst_57 = arith.constant dense<0.000000e+00> : vector<64x128xf32>
    %102 = tpu.matmul %99, %101, %cst_57 {dimension_numbers = #tpu.dot_dimension_numbers<[1], [0], [0], [1], [0, 0, 1, 1], [], []>} : vector<64x36xbf16>, vector<36x128xbf16>, vector<64x128xf32> -> vector<64x128xf32>
    %c0_58 = arith.constant 0 : index
    %c0_59 = arith.constant 0 : index
    %103 = vector.load %arg8[%c0_58, %c0_59] : memref<64x128xf32, #tpu.memory_space<vmem>>, vector<64x128xf32>
    %104 = arith.addf %103, %102 : vector<64x128xf32>
    %c0_60 = arith.constant 0 : index
    %c0_61 = arith.constant 0 : index
    %105 = vector.load %arg8[%c0_60, %c0_61] : memref<64x128xf32, #tpu.memory_space<vmem>>, vector<64x128xf32>
    tpu.vector_store %arg8[%c0_60, %c0_61], %104 {strides = array<i32>} : memref<64x128xf32, #tpu.memory_space<vmem>>, vector<64x128xf32>,
    %c16_i32_62 = arith.constant 16 : i32
    %106 = arith.addi %1, %c16_i32_62 : i32
    %c2_i32_63 = arith.constant 2 : i32
    %107 = arith.addi %106, %c2_i32_63 : i32
    %c0_64 = arith.constant 0 : index
    %108 = arith.index_cast %107 : i32 to index
    %c0_65 = arith.constant 0 : index
    %109 = vector.load %arg2[%c0_64, %108, %c0_65] : memref<1x290x36xf32, #tpu.memory_space<vmem>>, vector<1x64x36xf32>
    %110 = vector.shape_cast %109 : vector<1x64x36xf32> to vector<64x36xf32>
    %111 = arith.truncf %110 : vector<64x36xf32> to vector<64x36xbf16>
    %c0_i32_66 = arith.constant 0 : i32
    %112 = arith.sitofp %c0_i32_66 : i32 to bf16
    %113 = vector.shape_cast %65 : vector<64x1xi1> to vector<64x1xi1>
    %114 = vector.broadcast %113 : vector<64x1xi1> to vector<64x36xi1>
    %115 = vector.broadcast %112 : bf16 to vector<64x36xbf16>
    %116 = arith.select %114, %111, %115 : vector<64x36xi1>, vector<64x36xbf16>
    %c5 = arith.constant 5 : index
    %c0_67 = arith.constant 0 : index
    %c0_68 = arith.constant 0 : index
    %117 = vector.load %arg3[%c5, %c0_67, %c0_68] : memref<9x36x128xbf16, #tpu.memory_space<vmem>>, vector<1x36x128xbf16>
    %118 = vector.shape_cast %117 : vector<1x36x128xbf16> to vector<36x128xbf16>
    %cst_69 = arith.constant dense<0.000000e+00> : vector<64x128xf32>
    %119 = tpu.matmul %116, %118, %cst_69 {dimension_numbers = #tpu.dot_dimension_numbers<[1], [0], [0], [1], [0, 0, 1, 1], [], []>} : vector<64x36xbf16>, vector<36x128xbf16>, vector<64x128xf32> -> vector<64x128xf32>
    %c0_70 = arith.constant 0 : index
    %c0_71 = arith.constant 0 : index
    %120 = vector.load %arg8[%c0_70, %c0_71] : memref<64x128xf32, #tpu.memory_space<vmem>>, vector<64x128xf32>
    %121 = arith.addf %120, %119 : vector<64x128xf32>
    %c0_72 = arith.constant 0 : index
    %c0_73 = arith.constant 0 : index
    %122 = vector.load %arg8[%c0_72, %c0_73] : memref<64x128xf32, #tpu.memory_space<vmem>>, vector<64x128xf32>
    tpu.vector_store %arg8[%c0_72, %c0_73], %121 {strides = array<i32>} : memref<64x128xf32, #tpu.memory_space<vmem>>, vector<64x128xf32>,
    %c32_i32 = arith.constant 32 : i32
    %123 = arith.addi %1, %c32_i32 : i32
    %c0_i32_74 = arith.constant 0 : i32
    %124 = arith.addi %123, %c0_i32_74 : i32
    %c0_75 = arith.constant 0 : index
    %125 = arith.index_cast %124 : i32 to index
    %c0_76 = arith.constant 0 : index
    %126 = vector.load %arg2[%c0_75, %125, %c0_76] : memref<1x290x36xf32, #tpu.memory_space<vmem>>, vector<1x64x36xf32>
    %127 = vector.shape_cast %126 : vector<1x64x36xf32> to vector<64x36xf32>
    %128 = arith.truncf %127 : vector<64x36xf32> to vector<64x36xbf16>
    %c0_i32_77 = arith.constant 0 : i32
    %129 = arith.sitofp %c0_i32_77 : i32 to bf16
    %130 = vector.shape_cast %31 : vector<64x1xi1> to vector<64x1xi1>
    %131 = vector.broadcast %130 : vector<64x1xi1> to vector<64x36xi1>
    %132 = vector.broadcast %129 : bf16 to vector<64x36xbf16>
    %133 = arith.select %131, %128, %132 : vector<64x36xi1>, vector<64x36xbf16>
    %c6 = arith.constant 6 : index
    %c0_78 = arith.constant 0 : index
    %c0_79 = arith.constant 0 : index
    %134 = vector.load %arg3[%c6, %c0_78, %c0_79] : memref<9x36x128xbf16, #tpu.memory_space<vmem>>, vector<1x36x128xbf16>
    %135 = vector.shape_cast %134 : vector<1x36x128xbf16> to vector<36x128xbf16>
    %cst_80 = arith.constant dense<0.000000e+00> : vector<64x128xf32>
    %136 = tpu.matmul %133, %135, %cst_80 {dimension_numbers = #tpu.dot_dimension_numbers<[1], [0], [0], [1], [0, 0, 1, 1], [], []>} : vector<64x36xbf16>, vector<36x128xbf16>, vector<64x128xf32> -> vector<64x128xf32>
    %c0_81 = arith.constant 0 : index
    %c0_82 = arith.constant 0 : index
    %137 = vector.load %arg8[%c0_81, %c0_82] : memref<64x128xf32, #tpu.memory_space<vmem>>, vector<64x128xf32>
    %138 = arith.addf %137, %136 : vector<64x128xf32>
    %c0_83 = arith.constant 0 : index
    %c0_84 = arith.constant 0 : index
    %139 = vector.load %arg8[%c0_83, %c0_84] : memref<64x128xf32, #tpu.memory_space<vmem>>, vector<64x128xf32>
    tpu.vector_store %arg8[%c0_83, %c0_84], %138 {strides = array<i32>} : memref<64x128xf32, #tpu.memory_space<vmem>>, vector<64x128xf32>,
    %c32_i32_85 = arith.constant 32 : i32
    %140 = arith.addi %1, %c32_i32_85 : i32
    %c1_i32_86 = arith.constant 1 : i32
    %141 = arith.addi %140, %c1_i32_86 : i32
    %c0_87 = arith.constant 0 : index
    %142 = arith.index_cast %141 : i32 to index
    %c0_88 = arith.constant 0 : index
    %143 = vector.load %arg2[%c0_87, %142, %c0_88] : memref<1x290x36xf32, #tpu.memory_space<vmem>>, vector<1x64x36xf32>
    %144 = vector.shape_cast %143 : vector<1x64x36xf32> to vector<64x36xf32>
    %145 = arith.truncf %144 : vector<64x36xf32> to vector<64x36xbf16>
    %c7 = arith.constant 7 : index
    %c0_89 = arith.constant 0 : index
    %c0_90 = arith.constant 0 : index
    %146 = vector.load %arg3[%c7, %c0_89, %c0_90] : memref<9x36x128xbf16, #tpu.memory_space<vmem>>, vector<1x36x128xbf16>
    %147 = vector.shape_cast %146 : vector<1x36x128xbf16> to vector<36x128xbf16>
    %cst_91 = arith.constant dense<0.000000e+00> : vector<64x128xf32>
    %148 = tpu.matmul %145, %147, %cst_91 {dimension_numbers = #tpu.dot_dimension_numbers<[1], [0], [0], [1], [0, 0, 1, 1], [], []>} : vector<64x36xbf16>, vector<36x128xbf16>, vector<64x128xf32> -> vector<64x128xf32>
    %c0_92 = arith.constant 0 : index
    %c0_93 = arith.constant 0 : index
    %149 = vector.load %arg8[%c0_92, %c0_93] : memref<64x128xf32, #tpu.memory_space<vmem>>, vector<64x128xf32>
    %150 = arith.addf %149, %148 : vector<64x128xf32>
    %c0_94 = arith.constant 0 : index
    %c0_95 = arith.constant 0 : index
    %151 = vector.load %arg8[%c0_94, %c0_95] : memref<64x128xf32, #tpu.memory_space<vmem>>, vector<64x128xf32>
    tpu.vector_store %arg8[%c0_94, %c0_95], %150 {strides = array<i32>} : memref<64x128xf32, #tpu.memory_space<vmem>>, vector<64x128xf32>,
    %c32_i32_96 = arith.constant 32 : i32
    %152 = arith.addi %1, %c32_i32_96 : i32
    %c2_i32_97 = arith.constant 2 : i32
    %153 = arith.addi %152, %c2_i32_97 : i32
    %c0_98 = arith.constant 0 : index
    %154 = arith.index_cast %153 : i32 to index
    %c0_99 = arith.constant 0 : index
    %155 = vector.load %arg2[%c0_98, %154, %c0_99] : memref<1x290x36xf32, #tpu.memory_space<vmem>>, vector<1x64x36xf32>
    %156 = vector.shape_cast %155 : vector<1x64x36xf32> to vector<64x36xf32>
    %157 = arith.truncf %156 : vector<64x36xf32> to vector<64x36xbf16>
    %c0_i32_100 = arith.constant 0 : i32
    %158 = arith.sitofp %c0_i32_100 : i32 to bf16
    %159 = vector.shape_cast %65 : vector<64x1xi1> to vector<64x1xi1>
    %160 = vector.broadcast %159 : vector<64x1xi1> to vector<64x36xi1>
    %161 = vector.broadcast %158 : bf16 to vector<64x36xbf16>
    %162 = arith.select %160, %157, %161 : vector<64x36xi1>, vector<64x36xbf16>
    %c8 = arith.constant 8 : index
    %c0_101 = arith.constant 0 : index
    %c0_102 = arith.constant 0 : index
    %163 = vector.load %arg3[%c8, %c0_101, %c0_102] : memref<9x36x128xbf16, #tpu.memory_space<vmem>>, vector<1x36x128xbf16>
    %164 = vector.shape_cast %163 : vector<1x36x128xbf16> to vector<36x128xbf16>
    %cst_103 = arith.constant dense<0.000000e+00> : vector<64x128xf32>
    %165 = tpu.matmul %162, %164, %cst_103 {dimension_numbers = #tpu.dot_dimension_numbers<[1], [0], [0], [1], [0, 0, 1, 1], [], []>} : vector<64x36xbf16>, vector<36x128xbf16>, vector<64x128xf32> -> vector<64x128xf32>
    %c0_104 = arith.constant 0 : index
    %c0_105 = arith.constant 0 : index
    %166 = vector.load %arg8[%c0_104, %c0_105] : memref<64x128xf32, #tpu.memory_space<vmem>>, vector<64x128xf32>
    %167 = arith.addf %166, %165 : vector<64x128xf32>
    %c0_106 = arith.constant 0 : index
    %c0_107 = arith.constant 0 : index
    %168 = vector.load %arg8[%c0_106, %c0_107] : memref<64x128xf32, #tpu.memory_space<vmem>>, vector<64x128xf32>
    tpu.vector_store %arg8[%c0_106, %c0_107], %167 {strides = array<i32>} : memref<64x128xf32, #tpu.memory_space<vmem>>, vector<64x128xf32>,
    %c0_108 = arith.constant 0 : index
    %c0_109 = arith.constant 0 : index
    %169 = vector.load %arg8[%c0_108, %c0_109] : memref<64x128xf32, #tpu.memory_space<vmem>>, vector<64x128xf32>
    %c0_110 = arith.constant 0 : index
    %c0_111 = arith.constant 0 : index
    %170 = vector.load %arg4[%c0_110, %c0_111] : memref<1x128xf32, #tpu.memory_space<vmem>>, vector<1x128xf32>
    %171 = vector.broadcast %170 : vector<1x128xf32> to vector<64x128xf32>
    %172 = arith.addf %169, %171 : vector<64x128xf32>
    %c0_112 = arith.constant 0 : index
    %c0_113 = arith.constant 0 : index
    %173 = vector.load %arg5[%c0_112, %c0_113] : memref<64x32xf32, #tpu.memory_space<vmem>>, vector<64x32xf32>
    %174 = vector.extract_strided_slice %172 {offsets = [0, 0], sizes = [64, 96], strides = [1, 1]} : vector<64x128xf32> to vector<64x96xf32>
    %175 = arith.negf %174 : vector<64x96xf32>
    %176 = math.exp %175 : vector<64x96xf32>
    %cst_114 = arith.constant 1.000000e+00 : f32
    %177 = vector.broadcast %cst_114 : f32 to vector<64x96xf32>
    %178 = arith.addf %177, %176 : vector<64x96xf32>
    %179 = arith.divf %177, %178 : vector<64x96xf32>
    %180 = vector.extract_strided_slice %179 {offsets = [0, 0], sizes = [64, 32], strides = [1, 1]} : vector<64x96xf32> to vector<64x32xf32>
    %181 = vector.extract_strided_slice %179 {offsets = [0, 32], sizes = [64, 32], strides = [1, 1]} : vector<64x96xf32> to vector<64x32xf32>
    %182 = vector.extract_strided_slice %179 {offsets = [0, 64], sizes = [64, 32], strides = [1, 1]} : vector<64x96xf32> to vector<64x32xf32>
    %183 = arith.mulf %181, %173 : vector<64x32xf32>
    %184 = vector.extract_strided_slice %172 {offsets = [0, 96], sizes = [64, 32], strides = [1, 1]} : vector<64x128xf32> to vector<64x32xf32>
    %185 = math.tanh %184 : vector<64x32xf32>
    %186 = arith.mulf %180, %185 : vector<64x32xf32>
    %187 = arith.addf %183, %186 : vector<64x32xf32>
    %188 = math.tanh %187 : vector<64x32xf32>
    %189 = arith.mulf %182, %188 : vector<64x32xf32>
    %190 = arith.truncf %189 : vector<64x32xf32> to vector<64x32xbf16>
    %c0_115 = arith.constant 0 : index
    %c0_116 = arith.constant 0 : index
    %191 = vector.load %arg6[%c0_115, %c0_116] : memref<64x32xbf16, #tpu.memory_space<vmem>>, vector<64x32xbf16>
    tpu.vector_store %arg6[%c0_115, %c0_116], %190 {strides = array<i32>} : memref<64x32xbf16, #tpu.memory_space<vmem>>, vector<64x32xbf16>,
    %c0_117 = arith.constant 0 : index
    %c0_118 = arith.constant 0 : index
    %192 = vector.load %arg7[%c0_117, %c0_118] : memref<64x32xf32, #tpu.memory_space<vmem>>, vector<64x32xf32>
    tpu.vector_store %arg7[%c0_117, %c0_118], %187 {strides = array<i32>} : memref<64x32xf32, #tpu.memory_space<vmem>>, vector<64x32xf32>,
    return
  }
  func.func @transform_0(%arg0: i32, %arg1: i32) -> (i32, i32, i32) {
    %c0_i32 = arith.constant 0 : i32
    %c0_i32_0 = arith.constant 0 : i32
    %c0_i32_1 = arith.constant 0 : i32
    return %arg0, %c0_i32, %c0_i32_0 : i32, i32, i32
  }
  func.func @transform_1(%arg0: i32, %arg1: i32) -> (i32, i32, i32) {
    %c0_i32 = arith.constant 0 : i32
    %c0_i32_0 = arith.constant 0 : i32
    %c0_i32_1 = arith.constant 0 : i32
    %c0_i32_2 = arith.constant 0 : i32
    return %c0_i32, %c0_i32_0, %c0_i32_1 : i32, i32, i32
  }
  func.func @transform_2(%arg0: i32, %arg1: i32) -> (i32, i32) {
    %c0_i32 = arith.constant 0 : i32
    %c0_i32_0 = arith.constant 0 : i32
    %c0_i32_1 = arith.constant 0 : i32
    return %c0_i32, %c0_i32_0 : i32, i32
  }
  func.func @transform_3(%arg0: i32, %arg1: i32) -> (i32, i32) {
    %c4_i32 = arith.constant 4 : i32
    %0 = arith.muli %arg0, %c4_i32 : i32
    %1 = arith.addi %0, %arg1 : i32
    %c0_i32 = arith.constant 0 : i32
    %c0_i32_0 = arith.constant 0 : i32
    return %1, %c0_i32 : i32, i32
  }
  func.func @transform_4(%arg0: i32, %arg1: i32) -> (i32, i32) {
    %c4_i32 = arith.constant 4 : i32
    %0 = arith.muli %arg0, %c4_i32 : i32
    %1 = arith.addi %0, %arg1 : i32
    %c0_i32 = arith.constant 0 : i32
    %c0_i32_0 = arith.constant 0 : i32
    return %1, %c0_i32 : i32, i32
  }
  func.func @transform_5(%arg0: i32, %arg1: i32) -> (i32, i32) {
    %c4_i32 = arith.constant 4 : i32
    %0 = arith.muli %arg0, %c4_i32 : i32
    %1 = arith.addi %0, %arg1 : i32
    %c0_i32 = arith.constant 0 : i32
    %c0_i32_0 = arith.constant 0 : i32
    return %1, %c0_i32 : i32, i32
  }
}

</mosaic_0001>

<bundles_post_ra>
// kernel: convlstm_step_nchw.1
= control target key start
LH: loop header
LB: loop body
LE: loop exit
PB: predicated region body
PF: predicated region fallthrough
CT: control target
= control target key end

     0   :  { %s2691_s18 = smov 0   ;;  %s2693_s19 = smov 0   ;;  %s3410_s0 = inlined_call_operand.vmem [shape: f32[2,290,36], index: 0, kind: input, shape index: {}]   ;;  %s3411_s1 = inlined_call_operand.vmem [shape: bf16[9,36,128], index: 1, kind: input, shape index: {}]   ;;  %s3412_s2 = inlined_call_operand.vmem [shape: f32[1,128], index: 2, kind: input, shape index: {}]   ;;  %s3413_s3 = inlined_call_operand.vmem [shape: f32[512,32], index: 3, kind: input, shape index: {}, may-alias: {3,5}]   ;;  %s3414_s4 = inlined_call_operand.vmem [shape: bf16[512,32], index: 4, kind: output, shape index: {0}]   ;;  %s3415_s5 = inlined_call_operand.vmem [shape: f32[512,32], index: 5, kind: output, shape index: {1}, may-alias: {3,5}]  }
   0x1   :  { %s2695_s20 = smov 0   ;;  %s2697_s21 = smov 0  }
   0x2   :  { %s2699_s22 = smov 0  }
   0x3 LB: > { %s25_s23 = sadd.s32 1, %s2647_s20  ;;  %s28_s24 = sadd.s32 1, %s2651_s21  ;;  %s2655_s22 = sphi %s2699_s22, %s16_s22   ;;  %s2651_s21 = sphi %s2697_s21, %s3439_s21   ;;  %s2647_s20 = sphi %s2695_s20, %s3438_s20   ;;  %s2643_s19 = sphi %s2693_s19, %s3437_s19   ;;  %s2639_s18 = sphi %s2691_s18, %s3436_s18  }
   0x4   : > { %p26_p0 = scmp.ge.s32.totalorder %s25_s23, 4  ;;  %p2238_p1 = scmp.ge.s32.totalorder %s2655_s22, 1 }
   0x5   : > { %p229_p2 = scmp.lt.s32.totalorder %s2655_s22, 9 }
   0x6   : > { %s3441_s23 = smov (%p26_p0, %s25_s23), 0  ;;  %s3443_s24 = smov (!%p26_p0, %s28_s24), %s2651_s21 }
   0x7   : > { %p230_p3 = pnand %p2238_p1, %p229_p2  ;;  %p30_p4 = scmp.ge.s32.totalorder %s3443_s24, 2 }
   0x8   : > { %p273_p5 = scmp.lt.s32.totalorder (!%p230_p3), %s2643_s19, 1  ;;  %s2249_s9 = sshll.u32 (!%p230_p3), %s2639_s18, 6 }
   0x9   : > { %s3445_s24 = smov (%p30_p4, %s3443_s24), 0  ;;  %233 = sbr.rel (%p230_p3) target bundleno = 776 (0x308), region = 36 }
   0xa   : > { %s2240_s11 = sshll.u32 (!%p230_p3), %s2643_s19, 2  ;;  %s2659_s16 = smov (!%p230_p3), 96  }
   0xb   : > { %s279_s12 = sadd.s32 (!%p230_p3), %s2639_s18, %s2240_s11 }
   0xe   : > { %v500_v0 = vld [vmem:[%s3411_s1 + $0x10] sm:$0x3]  ;;  %v310_v1 = vlaneseq  ;;  %vm549_vm0 = vcmask 1041408   ;;  %v2301_v3 = vld [vmem:[%s3411_s1 + $0x38] sm:$0x3]  ;;  %s274_s29 = scalar_select %p273_p5, %s2643_s19, 1 }
   0xf   : > { %v530_v2 = vunpack.c.l.b16 %v500_v0  ;;  %v810_v5 = vunpack.c.l.b16 %v2301_v3  ;;  %v2327_v6 = vld [vmem:[%s3411_s1 + $0x4c] sm:$0x3]  ;;  %v2275_v7 = vld [vmem:[%s3411_s1 + $0x24] sm:$0x3]  ;;  %v2748_v15 = vld [vmem:[%s3411_s1 + $0x60] sm:$0x3] }
  0x10   : > { %v2733_v4 = vshrl.u32 %v310_v1, 7  ;;  %v945_v9 = vunpack.c.l.b16 %v2327_v6  ;;  %v619_v10 = vunpack.c.l.b16 %v2275_v7  ;;  %s2507_s10 = smul.u32 296, %s274_s29  ;;  %v2481_v17 = vld [vmem:[%s3411_s1 + $0x8] sm:$0xff]  ;;  %vm536_vm1 = vcmask 293888   ;;  %v2480_v31 = vld [vmem:[%s3411_s1] sm:$0xff]  ;;  %s2241_s19 = sshll.u32 %s279_s12, 3 }
  0x11   : > { %v533_v8 = vpack.c.b16 %v530_v2, %v530_v2  ;;  %v813_v14 = vpack.c.b16 %v810_v5, %v810_v5  ;;  %v2764_v25 = vld [vmem:[%s3411_s1 + $0x88] sm:$0x3]  ;;  %vm2657_vm2 = vmmov 1   ;;  %v1048_v30 = vunpack.c.l.b16 %v2748_v15  ;;  %p281_p6 = scmp.lt.s32.totalorder %s2241_s19, 63 }
  0x12   : > { %v313_v11 = vadd.s32 16, %v2733_v4  ;;  %v315_v12 = vadd.s32 32, %v2733_v4  ;;  %v317_v13 = vadd.s32 48, %v2733_v4  ;;  %v323_v18 = vand.u32 15, %v2733_v4  ;;  %s277_s17 = scalar_lea.vmem %s3410_s0, %s2507_s10  ;;  %vm2768_vm3 = vmpackc.low %vm2657_vm2, %vm2657_vm2  ;;  %s2658_s10 = smov 32  }
  0x13   : > { %v551_v16 = vsel %vm549_vm0, %v533_v8, 0  ;;  %v948_v19 = vpack.c.b16 %v945_v9, %v945_v9  ;;  %v622_v20 = vpack.c.b16 %v619_v10, %v619_v10  ;;  %v2759_v24 = vsel %vm549_vm0, %v813_v14, 0  ;;  %s2766_s27 = scalar_lea.vmem %s277_s17, %s2249_s9  ;;  %s3447_s19 = smov (!%p281_p6, %s2241_s19), 63 }
  0x14   : > { %2498 = vmatpush.bf16.msra.mxu1 %v551_v16  ;;  %2499 = vmatpush.bf16.msra.mxu2 %v551_v16  ;;  %v337_v21 = vand.u32 15, %v313_v11  ;;  %v351_v22 = vand.u32 15, %v315_v12  ;;  %v365_v23 = vand.u32 15, %v317_v13  ;;  %v432_v27 = vadd.s32 4294967295, %v323_v18  ;;  %v418_v32 = vld [vmem:[%s2766_s27 + $0x10] sm:$0xff]  ;;  %v419_v33 = vld [vmem:[%s2766_s27 + $0x18] sm:$0xff] }
  0x15   : > { %2500 = vmatpush.bf16.msra.mxu3 %v551_v16  ;;  %558 = vmatpush.bf16.msra.mxu0 %v551_v16  ;;  %v964_v28 = vsel %vm549_vm0, %v948_v19, 0  ;;  %v2774_v29 = vsel %vm549_vm0, %v622_v20, 0  ;;  %v420_v35 = vld [vmem:[%s2766_s27 + $0x20] sm:$0xff]  ;;  %v1318_v38 = vunpack.c.l.b16 %v2764_v25  ;;  %v2784_v39 = vpack.c.bf16 %v418_v32, %v418_v32  ;;  %v421_v41 = vld [vmem:[%s2766_s27 + $0x28] sm:$0xff]  ;;  %v422_v43 = vld [vmem:[%s2766_s27 + $0x30] sm:$0xff]  ;;  %s2242_s18 = sshll.u32 %s3447_s19, 3 }
  0x16   : > { %v434_v34 = vadd.s32 4294967295, %v337_v21  ;;  %v436_v36 = vadd.s32 4294967295, %v351_v22  ;;  %v438_v37 = vadd.s32 4294967295, %v365_v23  ;;  %v427_v40 = vpack.c.bf16 %v419_v33, %v419_v33  ;;  %v423_v44 = vld [vmem:[%s2766_s27 + $0x38] sm:$0xff]  ;;  %v416_v47 = vld [vmem:[%s2766_s27] sm:$0xff]  ;;  %v417_v48 = vld [vmem:[%s2766_s27 + $0x8] sm:$0xff]  ;;  %s284_s15 = scalar_lea.vmem %s3413_s3, %s2242_s18  ;;  %s3354_s28 = scalar_lea.vmem %s3415_s5, %s2242_s18 }
  0x17   : > { %v2787_v42 = vpack.c.bf16 %v420_v35, %v420_v35  ;;  %vm440_vm4 = vcmp.ge.s32.totalorder %v432_v27, 0  ;;  %v429_v45 = vpack.c.bf16 %v421_v41, %v421_v41  ;;  %v2791_v46 = vpack.c.bf16 %v422_v43, %v422_v43  ;;  %v2485_v12 = vld [vmem:[%s3411_s1 + $0x30] sm:$0xff]  ;;  %v2289_v14 = vld [vmem:[%s2766_s27 + $0x2] sm:$0xff]  ;;  %v2431_v18 = vld [vmem:[%s3411_s1 + $0x9c] sm:$0x3]  ;;  %s2660_s17 = smov 64  }
  0x18   : > { %2501 = vmatpush.bf16.msra.mxu1 %v2481_v17  ;;  %2502 = vmatpush.bf16.msra.mxu2 %v2481_v17  ;;  %vm442_vm5 = vcmp.ge.s32.totalorder %v434_v34, 0  ;;  %vm444_vm6 = vcmp.ge.s32.totalorder %v436_v36, 0  ;;  %vm2795_vm7 = vmpackc.low %vm440_vm4, %vm440_vm4  ;;  %v2805_v51 = vsel %vm2768_vm3, %v427_v40, 0  ;;  %v431_v52 = vpack.c.bf16 %v423_v44, %v423_v44  ;;  %v2487_v16 = vld [vmem:[%s3411_s1 + $0x44] sm:$0xff]  ;;  %v2379_v19 = vld [vmem:[%s3411_s1 + $0x74] sm:$0x3] }
  0x19   : > { %2503 = vmatpush.bf16.msra.mxu3 %v2481_v17  ;;  %559 = vmatpush.bf16.msra.mxu0 %v2481_v17  ;;  %vm2799_vm8 = vmpackc.low %vm442_vm5, %vm442_vm5  ;;  %vm446_vm9 = vcmp.ge.s32.totalorder %v438_v37, 0  ;;  %v424_v53 = vpack.c.bf16 %v416_v47, %v416_v47  ;;  %v512_v55 = vunpack.c.l.b16 %v2805_v51  ;;  %v493_v57 = vsel %vm2768_vm3, %v429_v45, 0  ;;  %v2483_v22 = vld [vmem:[%s3411_s1 + $0x1c] sm:$0xff]  ;;  %v2290_v23 = vld [vmem:[%s2766_s27 + $0xa] sm:$0xff]  ;;  %s2245_s29 = sshll.u32 %s3447_s19, 2 }
  0x1a   : > { %v490_v54 = vsel %vm2799_vm8, %v2784_v39, 0  ;;  %vm2811_vm10 = vmpackc.low %vm444_vm6, %vm444_vm6  ;;  %v425_v58 = vpack.c.bf16 %v417_v48, %v417_v48  ;;  %v2820_v61 = vunpack.c.l.b16 %v493_v57  ;;  %v495_v63 = vsel %vm2768_vm3, %v431_v52, 0  ;;  %v2489_v27 = vld [vmem:[%s3411_s1 + $0x58] sm:$0xff]  ;;  %v2488_v44 = vld [vmem:[%s3411_s1 + $0x50] sm:$0xff]  ;;  %s294_s7 = scalar_lea.vmem %s3414_s4, %s2245_s29 }
  0x1b   : > { %v511_v59 = vunpack.c.l.b16 %v490_v54  ;;  %v492_v60 = vsel %vm2811_vm10, %v2787_v42, 0  ;;  %vm2822_vm11 = vmpackc.low %vm446_vm9, %vm446_vm9  ;;  %v2831_v2 = vunpack.c.l.b16 %v495_v63  ;;  %v488_v3 = vsel %vm2795_vm7, %v424_v53, 0  ;;  %v2486_v34 = vld [vmem:[%s3411_s1 + $0x3c] sm:$0xff]  ;;  %v2482_v25 = vld [vmem:[%s3411_s1 + $0x14] sm:$0xff] }
  0x1c   : > { %2504 = vmatpush.bf16.msra.mxu1 %v2480_v31  ;;  %2505 = vmatpush.bf16.msra.mxu2 %v2480_v31  ;;  %v513_v0 = vunpack.c.l.b16 %v492_v60  ;;  %v494_v1 = vsel %vm2822_vm11, %v2791_v46, 0  ;;  %v489_v7 = vsel %vm2768_vm3, %v425_v58, 0  ;;  %v509_v8 = vunpack.c.l.b16 %v488_v3  ;;  %v2493_v60 = vld [vmem:[%s3411_s1 + $0x80] sm:$0xff]  ;;  %v2264_v63 = vld [vmem:[%s2766_s27 + $0x9] sm:$0xff]  ;;  %v2495_v3 = vld [vmem:[%s3411_s1 + $0x94] sm:$0xff] }
  0x1d   : > { %2506 = vmatpush.bf16.msra.mxu3 %v2480_v31  ;;  %560 = vmatpush.bf16.msra.mxu0 %v2480_v31  ;;  %v518_v5 = vpack.c.b16 %v512_v55, %v511_v59  ;;  %v515_v6 = vunpack.c.l.b16 %v494_v1  ;;  %v510_v10 = vunpack.c.l.b16 %v489_v7  ;;  %v1275_v11 = vsel %vm2795_vm7, %v2787_v42, 0  ;;  %v2484_v31 = vld [vmem:[%s3411_s1 + $0x28] sm:$0xff]  ;;  %v2451_v56 = vld [vmem:[%s2766_s27 + $0x52] sm:$0xff] }
  0x1e   : > { %v519_v9 = vpack.c.b16 %v2820_v61, %v513_v0  ;;  %v1051_v13 = vpack.c.b16 %v1048_v30, %v1048_v30  ;;  %v312_v17 = vadd.s32 8, %v2733_v4  ;;  %v1321_v30 = vpack.c.b16 %v1318_v38, %v1318_v38  ;;  %v2497_v51 = vld [vmem:[%s3411_s1 + $0xa8] sm:$0xff] }
  0x1f   : > { %2259 = vmatmul.msk.bf16.vlgmr.msra.gmra.mxu1 %vm536_vm1, %v518_v5  ;;  %v520_v15 = vpack.c.b16 %v2831_v2, %v515_v6  ;;  %v517_v20 = vpack.c.b16 %v510_v10, %v509_v8  ;;  %v1421_v32 = vunpack.c.l.b16 %v2431_v18  ;;  %v1183_v33 = vunpack.c.l.b16 %v2379_v19  ;;  %v2491_v6 = vld [vmem:[%s3411_s1 + $0x6c] sm:$0xff]  ;;  %v2342_v10 = vld [vmem:[%s2766_s27 + $0x19] sm:$0xff] }
  0x20   : > { %836 = vmatpush.bf16.msrb.mxu2 %v2759_v24  ;;  %645 = vmatpush.bf16.msrb.mxu1 %v2774_v29  ;;  %v1067_v21 = vsel %vm549_vm0, %v1051_v13, 0  ;;  %v2457_v24 = vld [vmem:[%s3411_s1 + $0xb0] sm:$0x3]  ;;  %v703_v29 = vpack.c.bf16 %v2289_v14, %v2289_v14  ;;  %v704_v35 = vpack.c.bf16 %v2290_v23, %v2290_v23  ;;  %v1337_v38 = vsel %vm549_vm0, %v1321_v30, 0 }
  0x21   : > { %971 = vmatpush.bf16.msrb.mxu3 %v964_v28  ;;  %2260 = vmatmul.msk.bf16.vlgmr.msra.gmra.mxu2 %vm536_vm1, %v519_v9  ;;  %v330_v28 = vand.u32 15, %v312_v17  ;;  %v1556_v37 = vunpack.c.l.b16 %v2457_v24  ;;  %v1424_v40 = vpack.c.b16 %v1421_v32, %v1421_v32  ;;  %v1186_v41 = vpack.c.b16 %v1183_v33, %v1183_v33  ;;  %v2341_v9 = vld [vmem:[%s2766_s27 + $0x11] sm:$0xff]  ;;  %v2343_v32 = vld [vmem:[%s2766_s27 + $0x21] sm:$0xff]  ;;  %v2344_v33 = vld [vmem:[%s2766_s27 + $0x29] sm:$0xff] }
  0x22   : > { %2261 = vmatmul.msk.bf16.vlgmr.msra.gmra.mxu3 %vm536_vm1, %v520_v15  ;;  %1074 = vmatpush.bf16.msrb.mxu0 %v1067_v21  ;;  %v314_v43 = vadd.s32 24, %v2733_v4  ;;  %v767_v45 = vsel %vm2768_vm3, %v703_v29, 0  ;;  %v902_v52 = vsel %vm2795_vm7, %v2784_v39, 0  ;;  %v2263_v39 = vld [vmem:[%s2766_s27 + $0x1] sm:$0xff]  ;;  %v1029_v14 = vpack.c.bf16 %v2342_v10, %v2341_v9  ;;  %v2291_v15 = vld [vmem:[%s2766_s27 + $0x12] sm:$0xff] }
  0x23   : > { %2258 = vmatmul.msk.bf16.vlgmr.msra.gmra.mxu0 %vm536_vm1, %v517_v20  ;;  %v712_v36 = vadd.s32 1, %v330_v28  ;;  %v1559_v47 = vpack.c.b16 %v1556_v37, %v1556_v37  ;;  %v1440_v53 = vsel %vm549_vm0, %v1424_v40, 0  ;;  %v1202_v54 = vsel %vm549_vm0, %v1186_v41, 0  ;;  %v2494_v20 = vld [vmem:[%s3411_s1 + $0x8c] sm:$0xff]  ;;  %v2490_v21 = vld [vmem:[%s3411_s1 + $0x64] sm:$0xff] }
  0x24   : > { %837 = vmatpush.bf16.msrb.mxu2 %v2485_v12  ;;  %646 = vmatpush.bf16.msrb.mxu1 %v2483_v22  ;;  %v344_v57 = vand.u32 15, %v314_v43  ;;  %v789_v0 = vunpack.c.l.b16 %v767_v45  ;;  %v924_v5 = vunpack.c.l.b16 %v902_v52  ;;  %v600_v8 = vpack.c.bf16 %v2264_v63, %v2263_v39  ;;  %v2346_v39 = vld [vmem:[%s2766_s27 + $0x39] sm:$0xff] }
  0x25   : > { %972 = vmatpush.bf16.msrb.mxu3 %v2487_v16  ;;  %vm728_vm12 = vcmp.lt.s32.totalorder %v712_v36, 16  ;;  %v1575_v59 = vsel %vm549_vm0, %v1559_v47, 0  ;;  %v2292_v16 = vld [vmem:[%s2766_s27 + $0x1a] sm:$0xff]  ;;  %v705_v17 = vpack.c.bf16 %v2291_v15, %v2291_v15  ;;  %v316_v22 = vadd.s32 40, %v2733_v4 }
  0x26   : > { %1075 = vmatpush.bf16.msrb.mxu0 %v2489_v27  ;;  %vm2894_vm13 = vmpackc.low %vm728_vm12, %vm728_vm12  ;;  %v714_v7 = vadd.s32 1, %v344_v57  ;;  %v932_v13 = vpack.c.b16 %v512_v55, %v924_v5  ;;  %v2926_v18 = vpack.c.bf16 %v2292_v16, %v2292_v16  ;;  %v2492_v55 = vld [vmem:[%s3411_s1 + $0x78] sm:$0xff]  ;;  %v904_v27 = vsel %vm2799_vm8, %v2787_v42, 0 }
  0x27   : > { %v768_v58 = vsel %vm2894_vm13, %v704_v35, 0  ;;  %v2948_v23 = vsel %vm2768_vm3, %v705_v17, 0  ;;  %v358_v28 = vand.u32 15, %v316_v22  ;;  %v2962_v37 = vpack.c.bf16 %v2344_v33, %v2343_v32  ;;  %v2295_v5 = vld [vmem:[%s2766_s27 + $0x32] sm:$0xff] }
  0x28   : > { %838 = vmatpush.bf16.msrb.mxu2 %v2484_v31  ;;  %647 = vmatpush.bf16.msrb.mxu1 %v2482_v25  ;;  %v790_v1 = vunpack.c.l.b16 %v768_v58  ;;  %vm730_vm14 = vcmp.lt.s32.totalorder %v714_v7, 16  ;;  %v791_v29 = vunpack.c.l.b16 %v2948_v23  ;;  %v926_v31 = vunpack.c.l.b16 %v904_v27  ;;  %v2293_v25 = vld [vmem:[%s2766_s27 + $0x22] sm:$0xff] }
  0x29   : > { %973 = vmatpush.bf16.msrb.mxu3 %v2486_v34  ;;  %vm2928_vm15 = vmpackc.low %vm730_vm14, %vm730_vm14  ;;  %v716_v34 = vadd.s32 1, %v358_v28  ;;  %v707_v40 = vpack.c.bf16 %v2293_v25, %v2293_v25  ;;  %v318_v45 = vadd.s32 56, %v2733_v4  ;;  %v2321_v7 = vld [vmem:[%s2766_s27 + $0x40] sm:$0xff]  ;;  %v709_v42 = vpack.c.bf16 %v2295_v5, %v2295_v5 }
  0x2a   : > { %1076 = vmatpush.bf16.msrb.mxu0 %v2488_v44  ;;  %v797_v12 = vpack.c.b16 %v790_v1, %v789_v0  ;;  %v770_v24 = vsel %vm2928_vm15, %v2926_v18, 0  ;;  %v933_v36 = vpack.c.b16 %v2820_v61, %v926_v31  ;;  %v2496_v44 = vld [vmem:[%s3411_s1 + $0xa0] sm:$0xff]  ;;  %v900_v10 = vpack.c.bf16 %v2321_v7, %v2321_v7 }
  0x2b   : > { %v792_v30 = vunpack.c.l.b16 %v770_v24  ;;  %vm732_vm0 = vcmp.lt.s32.totalorder %v716_v34, 16  ;;  %v771_v47 = vsel %vm2768_vm3, %v707_v40, 0  ;;  %v1277_v24 = vsel %vm2799_vm8, %v2791_v46, 0  ;;  %v2449_v25 = vld [vmem:[%s2766_s27 + $0x42] sm:$0xff] }
  0x2c   : > { %1344 = vmatpush.bf16.msra.mxu2 %v1337_v38  ;;  %1209 = vmatpush.bf16.msra.mxu1 %v1202_v54  ;;  %v2294_v38 = vld [vmem:[%s2766_s27 + $0x2a] sm:$0xff]  ;;  %vm2973_vm2 = vmpackc.low %vm732_vm0, %vm732_vm0  ;;  %v372_v54 = vand.u32 15, %v318_v45  ;;  %v793_v57 = vunpack.c.l.b16 %v771_v47  ;;  %v1299_v28 = vunpack.c.l.b16 %v1277_v24  ;;  %v1141_v32 = vsel %vm2894_vm13, %v2926_v18, 0 }
  0x2d   : > { %1447 = vmatpush.bf16.msra.mxu3 %v1440_v53  ;;  %v798_v35 = vpack.c.b16 %v792_v30, %v791_v29  ;;  %v2969_v41 = vpack.c.bf16 %v2294_v38, %v2294_v38  ;;  %v906_v53 = vsel %vm2811_vm10, %v2791_v46, 0  ;;  %v1163_v33 = vunpack.c.l.b16 %v1141_v32  ;;  %v2450_v38 = vld [vmem:[%s2766_s27 + $0x4a] sm:$0xff] }
  0x2e   : > { %1582 = vmatpush.bf16.msra.mxu0 %v1575_v59  ;;  %v928_v4 = vunpack.c.l.b16 %v906_v53  ;;  %v1297_v59 = vunpack.c.l.b16 %v1275_v11  ;;  %v718_v63 = vadd.s32 1, %v372_v54  ;;  %v1306_v31 = vpack.c.b16 %v2831_v2, %v1299_v28 }
  0x2f   : > { %2284 = vmatmul.msk.bf16.vlgmr.msrb.gmra.mxu1 %vm536_vm1, %v600_v8  ;;  %v772_v52 = vsel %vm2973_vm2, %v2969_v41, 0  ;;  %v2322_v8 = vld [vmem:[%s2766_s27 + $0x48] sm:$0xff]  ;;  %v1514_v46 = vsel %vm2894_vm13, %v2969_v41, 0  ;;  %v1143_v48 = vsel %vm2928_vm15, %v2969_v41, 0  ;;  %v1510_v40 = vpack.c.bf16 %v2450_v38, %v2450_v38 }
  0x30   : > { %1345 = vmatpush.bf16.msra.mxu2 %v2493_v60  ;;  %1210 = vmatpush.bf16.msra.mxu1 %v2491_v6  ;;  %v794_v58 = vunpack.c.l.b16 %v772_v52  ;;  %v2345_v60 = vld [vmem:[%s2766_s27 + $0x31] sm:$0xff]  ;;  %v934_v1 = vpack.c.b16 %v2831_v2, %v928_v4  ;;  %v2296_v6 = vld [vmem:[%s2766_s27 + $0x3a] sm:$0xff]  ;;  %vm734_vm4 = vcmp.lt.s32.totalorder %v718_v63, 16  ;;  %v1305_v49 = vpack.c.b16 %v2820_v61, %v1297_v59 }
  0x31   : > { %1448 = vmatpush.bf16.msra.mxu3 %v2495_v3  ;;  %2310 = vmatmul.msk.bf16.vlgmr.msrb.gmra.mxu2 %vm536_vm1, %v797_v12  ;;  %v1031_v3 = vpack.c.bf16 %v2346_v39, %v2345_v60  ;;  %v710_v11 = vpack.c.bf16 %v2296_v6, %v2296_v6  ;;  %vm3006_vm5 = vmpackc.low %vm734_vm4, %vm734_vm4  ;;  %v901_v12 = vpack.c.bf16 %v2322_v8, %v2322_v8  ;;  %v1536_v50 = vunpack.c.l.b16 %v1514_v46  ;;  %v2399_v59 = vld [vmem:[%s2766_s27 + $0x50] sm:$0xff]  ;;  %v2400_v60 = vld [vmem:[%s2766_s27 + $0x58] sm:$0xff] }
  0x32   : > { %2336 = vmatmul.msk.bf16.vlgmr.msrb.gmra.mxu3 %vm536_vm1, %v932_v13  ;;  %1583 = vmatpush.bf16.msra.mxu0 %v2497_v51  ;;  %v799_v0 = vpack.c.b16 %v794_v58, %v793_v57  ;;  %v773_v13 = vsel %vm2768_vm3, %v709_v42, 0  ;;  %v1170_v2 = vpack.c.b16 %v1163_v33, %v791_v29  ;;  %v1165_v18 = vunpack.c.l.b16 %v1143_v48  ;;  %v2452_v39 = vld [vmem:[%s2766_s27 + $0x5a] sm:$0xff] }
  0x33   : > { %2362 = vmatmul.msk.bf16.vlgmr.msrb.gmra.mxu0 %vm536_vm1, %v1029_v14  ;;  %v774_v61 = vsel %vm3006_vm5, %v710_v11, 0  ;;  %v909_v15 = vsel %vm2768_vm3, %v901_v12, 0  ;;  %v795_v16 = vunpack.c.l.b16 %v773_v13  ;;  %v1543_v34 = vpack.c.b16 %v1536_v50, %v793_v57  ;;  %v2426_v12 = vld [vmem:[%s2766_s27 + $0x59] sm:$0xff] }
  0x34   : > { %1346 = vmatpush.bf16.msra.mxu2 %v2492_v55  ;;  %1211 = vmatpush.bf16.msra.mxu1 %v2490_v21  ;;  %v796_v17 = vunpack.c.l.b16 %v774_v61  ;;  %v931_v55 = vunpack.c.l.b16 %v909_v15  ;;  %v2348_v21 = vld [vmem:[%s2766_s27 + $0x49] sm:$0xff]  ;;  %v1516_v23 = vsel %vm2928_vm15, %v710_v11, 0  ;;  %v1171_v29 = vpack.c.b16 %v1165_v18, %v793_v57 }
  0x35   : > { %1449 = vmatpush.bf16.msra.mxu3 %v2494_v20  ;;  %v2347_v20 = vld [vmem:[%s2766_s27 + $0x41] sm:$0xff]  ;;  %v1145_v19 = vsel %vm2973_vm2, %v710_v11, 0  ;;  %v1279_v41 = vsel %vm2811_vm10, %v900_v10, 0  ;;  %v1518_v47 = vsel %vm2973_vm2, %v1510_v40, 0  ;;  %v1273_v43 = vpack.c.bf16 %v2399_v59, %v2399_v59 }
  0x36   : > { %1584 = vmatpush.bf16.msra.mxu0 %v2496_v44  ;;  %v800_v22 = vpack.c.b16 %v796_v17, %v795_v16  ;;  %v1032_v30 = vpack.c.bf16 %v2348_v21, %v2347_v20  ;;  %v1167_v44 = vunpack.c.l.b16 %v1145_v19  ;;  %v1301_v52 = vunpack.c.l.b16 %v1279_v41 }
  0x37   : > { %v1540_v54 = vunpack.c.l.b16 %v1518_v47  ;;  %v1274_v63 = vpack.c.bf16 %v2400_v60, %v2400_v60  ;;  %v1281_v5 = vsel %vm2822_vm11, %v1273_v43, 0 }
  0x38   : > { %v1172_v57 = vpack.c.b16 %v1167_v44, %v795_v16  ;;  %v1307_v58 = vpack.c.b16 %v931_v55, %v1301_v52  ;;  %v1303_v42 = vunpack.c.l.b16 %v1281_v5 }
  0x39   : > { %v1282_v6 = vsel %vm2768_vm3, %v1274_v63, 0 }
  0x3a   : > { %v1304_v11 = vunpack.c.l.b16 %v1282_v6 }
  0x3c   : > { %v1308_v62 = vpack.c.b16 %v1304_v11, %v1303_v42 }
  0x3f   : > { %2285 = vmatmul.msk.bf16.gmra.mxu1 %vm536_vm1, %v1029_v14  ;;  %v908_v14 = vsel %vm2822_vm11, %v900_v10, 0  ;;  %v2425_v10 = vld [vmem:[%s2766_s27 + $0x51] sm:$0xff] }
  0x40   : > { %v930_v51 = vunpack.c.l.b16 %v908_v14 }
  0x41   : > { %2311 = vmatmul.msk.bf16.gmra.mxu2 %vm536_vm1, %v798_v35  ;;  %v1538_v35 = vunpack.c.l.b16 %v1516_v23 }
  0x42   : > { %2337 = vmatmul.msk.bf16.gmra.mxu3 %vm536_vm1, %v933_v36  ;;  %v935_v27 = vpack.c.b16 %v931_v55, %v930_v51 }
  0x43   : > { %2363 = vmatmul.msk.bf16.gmra.mxu0 %vm536_vm1, %v2962_v37  ;;  %v1544_v36 = vpack.c.b16 %v1538_v35, %v795_v16  ;;  %v1405_v16 = vpack.c.bf16 %v2426_v12, %v2425_v10  ;;  %v3129_v10 = vld [vmem:[%s3412_s2] ss:$0 sm:$0xff] }
  0x4f   : > { %2286 = vmatmul.msk.bf16.gmra.mxu1 %vm536_vm1, %v2962_v37 }
  0x51   : > { %2312 = vmatmul.msk.bf16.gmra.mxu2 %vm536_vm1, %v799_v0  ;;  %v1511_v0 = vpack.c.bf16 %v2451_v56, %v2451_v56 }
  0x52   : > { %2338 = vmatmul.msk.bf16.gmra.mxu3 %vm536_vm1, %v934_v1  ;;  %v1512_v1 = vpack.c.bf16 %v2452_v39, %v2452_v39 }
  0x53   : > { %2364 = vmatmul.msk.bf16.gmra.mxu0 %vm536_vm1, %v1031_v3  ;;  %v1519_v8 = vsel %vm2768_vm3, %v1511_v0, 0 }
  0x54   : > { %v1541_v13 = vunpack.c.l.b16 %v1519_v8 }
  0x5f   : > { %2287 = vmatmul.msk.bf16.gmra.mxu1 %vm536_vm1, %v1031_v3 }
  0x61   : > { %2313 = vmatmul.msk.bf16.gmra.mxu2 %vm536_vm1, %v800_v22 }
  0x62   : > { %2339 = vmatmul.msk.bf16.gmra.mxu3 %vm536_vm1, %v935_v27 }
  0x63   : > { %2365 = vmatmul.msk.bf16.gmra.mxu0 %vm536_vm1, %v1032_v30 }
  0x6f   : > { %2388 = vmatmul.msk.bf16.vlgmr.msra.gmra.mxu1 %vm536_vm1, %v1170_v2 }
  0x71   : > { %2414 = vmatmul.msk.bf16.vlgmr.msra.gmra.mxu2 %vm536_vm1, %v1305_v49  ;;  %v1520_v49 = vsel %vm3006_vm5, %v1512_v1, 0 }
  0x72   : > { %2440 = vmatmul.msk.bf16.vlgmr.msra.gmra.mxu3 %vm536_vm1, %v2962_v37  ;;  %v1509_v37 = vpack.c.bf16 %v2449_v25, %v2449_v25  ;;  %v1542_v61 = vunpack.c.l.b16 %v1520_v49 }
  0x73   : > { %2466 = vmatmul.msk.bf16.vlgmr.msra.gmra.mxu0 %vm536_vm1, %v1543_v34 }
  0x74   : > { %v1517_v45 = vsel %vm2768_vm3, %v1509_v37, 0  ;;  %v1546_v17 = vpack.c.b16 %v1542_v61, %v1541_v13 }
  0x75   : > { %v1539_v53 = vunpack.c.l.b16 %v1517_v45 }
  0x77   : > { %v1545_v4 = vpack.c.b16 %v1540_v54, %v1539_v53 }
  0x7f   : > { %2389 = vmatmul.msk.bf16.gmra.mxu1 %vm536_vm1, %v1171_v29 }
  0x81   : > { %2415 = vmatmul.msk.bf16.gmra.mxu2 %vm536_vm1, %v1306_v31 }
  0x82   : > { %2441 = vmatmul.msk.bf16.gmra.mxu3 %vm536_vm1, %v1031_v3  ;;  %v1147_v3 = vsel %vm3006_vm5, %v1510_v40, 0 }
  0x83   : > { %2467 = vmatmul.msk.bf16.gmra.mxu0 %vm536_vm1, %v1544_v36  ;;  %v1169_v7 = vunpack.c.l.b16 %v1147_v3 }
  0x85   : > { %v1173_v14 = vpack.c.b16 %v1169_v7, %v1539_v53 }
  0x8f   : > { %2390 = vmatmul.msk.bf16.gmra.mxu1 %vm536_vm1, %v1172_v57 }
  0x91   : > { %2416 = vmatmul.msk.bf16.gmra.mxu2 %vm536_vm1, %v1307_v58 }
  0x92   : > { %2442 = vmatmul.msk.bf16.gmra.mxu3 %vm536_vm1, %v1032_v30 }
  0x93   : > { %2468 = vmatmul.msk.bf16.gmra.mxu0 %vm536_vm1, %v1545_v4 }
  0x9c   : > { %v567_v15 = vpop.f32.mrf.mxu1 }
  0x9f   : > { %2391 = vmatmul.msk.bf16.gmra.mxu1 %vm536_vm1, %v1173_v14 }
  0xa0   : > { %v562_v51 = vpop.f32.mrf.mxu0 }
  0xa1   : > { %2417 = vmatmul.msk.bf16.gmra.mxu2 %vm536_vm1, %v1308_v62 }
  0xa2   : > { %2443 = vmatmul.msk.bf16.gmra.mxu3 %vm536_vm1, %v1405_v16 }
  0xa3   : > { %2469 = vmatmul.msk.bf16.gmra.mxu0 %vm536_vm1, %v1546_v17 }
  0xa4   : > { %v3084_v26 = vpop.f32.mrf.mxu2  ;;  %v3088_v55 = vpop.f32.mrf.mxu1 }
  0xa5   : > { %v3086_v9 = vpop.f32.mrf.mxu3 }
  0xa8   : > { %v564_v20 = vpop.f32.mrf.mxu0 }
  0xac   : > { %v3090_v21 = vpop.f32.mrf.mxu2  ;;  %v649_v24 = vpop.f32.mrf.mxu1 }
  0xad   : > { %v3092_v22 = vpop.f32.mrf.mxu3  ;;  %v677_v57 = vadd.f32 %v649_v24, %v562_v51 }
  0xb0   : > { %v1078_v27 = vpop.f32.mrf.mxu0 }
  0xb4   : > { %v840_v28 = vpop.f32.mrf.mxu2  ;;  %v651_v31 = vpop.f32.mrf.mxu1 }
  0xb5   : > { %v975_v30 = vpop.f32.mrf.mxu3  ;;  %v868_v4 = vadd.f32 %v840_v28, %v677_v57  ;;  %v678_v43 = vadd.f32 %v651_v31, %v564_v20 }
  0xb7   : > { %v1003_v60 = vadd.f32 %v975_v30, %v868_v4 }
  0xb8   : > { %v1080_v32 = vpop.f32.mrf.mxu0 }
  0xb9   : > { %v1106_v1 = vadd.f32 %v1078_v27, %v1003_v60 }
  0xbc   : > { %v842_v33 = vpop.f32.mrf.mxu2  ;;  %v654_v50 = vpop.f32.mrf.mxu1 }
  0xbd   : > { %v977_v46 = vpop.f32.mrf.mxu3  ;;  %v869_v0 = vadd.f32 %v842_v33, %v678_v43  ;;  %v679_v42 = vadd.f32 %v654_v50, %v567_v15 }
  0xbf   : > { %v1004_v6 = vadd.f32 %v977_v46, %v869_v0 }
  0xc0   : > { %v1083_v2 = vpop.f32.mrf.mxu0 }
  0xc1   : > { %v1107_v14 = vadd.f32 %v1080_v32, %v1004_v6 }
  0xc4   : > { %v845_v34 = vpop.f32.mrf.mxu2  ;;  %v656_v18 = vpop.f32.mrf.mxu1 }
  0xc5   : > { %v980_v48 = vpop.f32.mrf.mxu3  ;;  %v870_v13 = vadd.f32 %v845_v34, %v679_v42  ;;  %v680_v15 = vadd.f32 %v656_v18, %v3088_v55 }
  0xc7   : > { %v1005_v51 = vadd.f32 %v980_v48, %v870_v13 }
  0xc8   : > { %v3094_v23 = vpop.f32.mrf.mxu0 }
  0xc9   : > { %v1108_v46 = vadd.f32 %v1083_v2, %v1005_v51 }
  0xcc   : > { %v847_v35 = vpop.f32.mrf.mxu2  ;;  %v659_v36 = vpop.f32.mrf.mxu1 }
  0xcd   : > { %v982_v29 = vpop.f32.mrf.mxu3  ;;  %v871_v31 = vadd.f32 %v847_v35, %v680_v15  ;;  %v681_v18 = vadd.f32 %v659_v36, %v3084_v26 }
  0xcf   : > { %v1006_v48 = vadd.f32 %v982_v29, %v871_v31 }
  0xd0   : > { %v3096_v25 = vpop.f32.mrf.mxu0 }
  0xd4   : > { %v3098_v38 = vpop.f32.mrf.mxu2  ;;  %v3102_v40 = vpop.f32.mrf.mxu1 }
  0xd5   : > { %v3100_v37 = vpop.f32.mrf.mxu3  ;;  %v872_v2 = vadd.f32 %v3098_v38, %v681_v18  ;;  %v682_v36 = vadd.f32 %v3102_v40, %v3090_v21 }
  0xd8   : > { %v3104_v19 = vpop.f32.mrf.mxu0 }
  0xdc   : > { %v3106_v41 = vpop.f32.mrf.mxu2  ;;  %v3110_v45 = vpop.f32.mrf.mxu1 }
  0xdd   : > { %v3108_v44 = vpop.f32.mrf.mxu3 }
  0xe0   : > { %v3112_v47 = vpop.f32.mrf.mxu0 }
  0xe4   : > { %v3114_v52 = vpop.f32.mrf.mxu2  ;;  %v3118_v54 = vpop.f32.mrf.mxu1 }
  0xe5   : > { %v3116_v53 = vpop.f32.mrf.mxu3 }
  0xe8   : > { %v3120_v58 = vpop.f32.mrf.mxu0 }
  0xec   : > { %v3122_v59 = vpop.f32.mrf.mxu2  ;;  %v1213_v39 = vpop.f32.mrf.mxu1 }
  0xed   : > { %v3124_v56 = vpop.f32.mrf.mxu3  ;;  %v1241_v3 = vadd.f32 %v1213_v39, %v1106_v1 }
  0xf0   : > { %v1586_v63 = vpop.f32.mrf.mxu0 }
  0xf4   : > { %v1348_v5 = vpop.f32.mrf.mxu2  ;;  %v1215_v49 = vpop.f32.mrf.mxu1 }
  0xf5   : > { %v1376_v7 = vadd.f32 %v1348_v5, %v1241_v3  ;;  %v1451_v8 = vpop.f32.mrf.mxu3  ;;  %v1242_v16 = vadd.f32 %v1215_v49, %v1107_v14  ;;  %v1007_v5 = vadd.f32 %v3100_v37, %v872_v2 }
  0xf7   : > { %v1479_v11 = vadd.f32 %v1451_v8, %v1376_v7  ;;  %v1110_v49 = vadd.f32 %v3096_v25, %v1007_v5  ;;  %v683_v25 = vadd.f32 %v3110_v45, %v3086_v9 }
  0xf8   : > { %v1588_v12 = vpop.f32.mrf.mxu0 }
  0xf9   : > { %v1614_v61 = vadd.f32 %v1586_v63, %v1479_v11  ;;  %v1109_v63 = vadd.f32 %v3094_v23, %v1006_v48  ;;  %v873_v23 = vadd.f32 %v3106_v41, %v682_v36  ;;  %v1656_v36 = vld [vmem:[%s284_s15 + $0x30] sm:$0xff] }
  0xfb   : > { %v3132_v62 = vadd.f32 %v3129_v10, %v1614_v61  ;;  %v1008_v61 = vadd.f32 %v3108_v44, %v873_v23  ;;  %v1654_v23 = vld [vmem:[%s284_s15 + $0x20] sm:$0xff] }
  0xfc   : > { %v1350_v17 = vpop.f32.mrf.mxu2  ;;  %v1218_v27 = vpop.f32.mrf.mxu1 }
  0xfd   : > { %v1377_v20 = vadd.f32 %v1350_v17, %v1242_v16  ;;  %v1453_v24 = vpop.f32.mrf.mxu3  ;;  %2553 = vtanh.f32 %v3132_v62  ;;  %v1243_v34 = vadd.f32 %v1218_v27, %v1108_v46  ;;  %v874_v16 = vadd.f32 %v3114_v52, %v683_v25 }
  0xfe   : > { %v1111_v51 = vadd.f32 %v3104_v19, %v1008_v61  ;;  %v684_v19 = vadd.f32 %v3118_v54, %v3092_v22 }
  0xff   : > { %v1480_v28 = vadd.f32 %v1453_v24, %v1377_v20 }
 0x100   : > { %v1591_v30 = vpop.f32.mrf.mxu0  ;;  %v875_v31 = vadd.f32 %v3122_v59, %v684_v19 }
 0x101   : > { %v1615_v33 = vadd.f32 %v1588_v12, %v1480_v28  ;;  %v1009_v28 = vadd.f32 %v3116_v53, %v874_v16 }
 0x102   : > { %v1010_v48 = vadd.f32 %v3124_v56, %v875_v31 }
 0x103   : > { %v2554_v50 = vpop.eup %2553  ;;  %v3137_v32 = vadd.f32 %v3129_v10, %v1615_v33  ;;  %v1112_v46 = vadd.f32 %v3112_v47, %v1009_v28 }
 0x104   : > { %v1353_v57 = vpop.f32.mrf.mxu2  ;;  %1866 = vrot.lane.b32.xlu0 %v2554_v50, %s2658_s10  ;;  %v1220_v55 = vpop.f32.mrf.mxu1 }
 0x105   : > { %2555 = vtanh.f32 %v3137_v32  ;;  %v1378_v4 = vadd.f32 %v1353_v57, %v1243_v34  ;;  %v1456_v60 = vpop.f32.mrf.mxu3  ;;  %v1244_v3 = vadd.f32 %v1220_v55, %v1109_v63  ;;  %v1113_v55 = vadd.f32 %v3120_v58, %v1010_v48 }
 0x107   : > { %v1481_v35 = vadd.f32 %v1456_v60, %v1378_v4 }
 0x108   : > { %v1593_v39 = vpop.f32.mrf.mxu0 }
 0x109   : > { %v1616_v43 = vadd.f32 %v1591_v30, %v1481_v35 }
 0x10b   : > { %v2556_v0 = vpop.eup %2555  ;;  %v3145_v1 = vadd.f32 %v3129_v10, %v1616_v43 }
 0x10c   : > { %v1355_v29 = vpop.f32.mrf.mxu2  ;;  %1868 = vrot.lane.b32.xlu0 %v2556_v0, %s2658_s10  ;;  %v1223_v26 = vpop.f32.mrf.mxu1 }
 0x10d   : > { %v1379_v6 = vadd.f32 %v1355_v29, %v1244_v3  ;;  %v1458_v7 = vpop.f32.mrf.mxu3  ;;  %2557 = vtanh.f32 %v3145_v1  ;;  %v1245_v37 = vadd.f32 %v1223_v26, %v1110_v49  ;;  %v1650_v3 = vld [vmem:[%s284_s15] sm:$0xff]  ;;  %v1657_v49 = vld [vmem:[%s284_s15 + $0x38] sm:$0xff] }
 0x10f   : > { %v1482_v38 = vadd.f32 %v1458_v7, %v1379_v6  ;;  %v1653_v6 = vld [vmem:[%s284_s15 + $0x18] sm:$0xff]  ;;  %v1651_v7 = vld [vmem:[%s284_s15 + $0x8] sm:$0xff] }
 0x110   : > { %v1596_v42 = vpop.f32.mrf.mxu0 }
 0x111   : > { %v1617_v8 = vadd.f32 %v1593_v39, %v1482_v38  ;;  %v1652_v38 = vld [vmem:[%s284_s15 + $0x10] sm:$0xff] }
 0x113   : > { %v2558_v11 = vpop.eup %2557  ;;  %v3155_v12 = vadd.f32 %v3129_v10, %v1617_v8  ;;  %v1655_v8 = vld [vmem:[%s284_s15 + $0x28] sm:$0xff] }
 0x114   : > { %v1358_v13 = vpop.f32.mrf.mxu2  ;;  %1870 = vrot.lane.b32.xlu1 %v2558_v11, %s2658_s10  ;;  %v1225_v41 = vpop.f32.mrf.mxu1 }
 0x115   : > { %2559 = vtanh.f32 %v3155_v12  ;;  %v1380_v21 = vadd.f32 %v1358_v13, %v1245_v37  ;;  %v1461_v40 = vpop.f32.mrf.mxu3  ;;  %v1246_v44 = vadd.f32 %v1225_v41, %v1111_v51  ;;  %v2472_v13 = vmul.f32 -1.442695, %v3145_v1 }
 0x116   : > { %v2473_v41 = vmul.f32 -1.442695, %v3155_v12 }
 0x117   : > { %v1483_v14 = vadd.f32 %v1461_v40, %v1380_v21 }
 0x118   : > { %v1598_v27 = vpop.f32.mrf.mxu0 }
 0x119   : > { %v1618_v17 = vadd.f32 %v1596_v42, %v1483_v14  ;;  %v2471_v42 = vmul.f32 -1.442695, %v3137_v32 }
 0x11b   : > { %v2560_v20 = vpop.eup %2559  ;;  %v3166_v24 = vadd.f32 %v3129_v10, %v1618_v17 }
 0x11c   : > { %v1360_v15 = vpop.f32.mrf.mxu2  ;;  %1872 = vrot.lane.b32.xlu1 %v2560_v20, %s2658_s10  ;;  %v1228_v52 = vpop.f32.mrf.mxu1 }
 0x11d   : > { %v1381_v9 = vadd.f32 %v1360_v15, %v1246_v44  ;;  %v1463_v45 = vpop.f32.mrf.mxu3  ;;  %2561 = vtanh.f32 %v3166_v24  ;;  %v1247_v53 = vadd.f32 %v1228_v52, %v1112_v46  ;;  %v2474_v61 = vmul.f32 -1.442695, %v3166_v24 }
 0x11f   : > { %v1484_v30 = vadd.f32 %v1463_v45, %v1381_v9 }
 0x120   : > { %v1601_v4 = vpop.f32.mrf.mxu0 }
 0x121   : > { %v1619_v33 = vadd.f32 %v1598_v27, %v1484_v30 }
 0x123   : > { %v2562_v50 = vpop.eup %2561  ;;  %v3177_v34 = vadd.f32 %v3129_v10, %v1619_v33 }
 0x124   : > { %v1363_v57 = vpop.f32.mrf.mxu2  ;;  %1874 = vrot.lane.b32.xlu2 %v2562_v50, %s2658_s10  ;;  %v1230_v47 = vpop.f32.mrf.mxu1 }
 0x125   : > { %2563 = vtanh.f32 %v3177_v34  ;;  %v1382_v22 = vadd.f32 %v1363_v57, %v1247_v53  ;;  %v1466_v54 = vpop.f32.mrf.mxu3  ;;  %v1248_v39 = vadd.f32 %v1230_v47, %v1113_v55  ;;  %v2475_v25 = vmul.f32 -1.442695, %v3177_v34 }
 0x127   : > { %v1485_v59 = vadd.f32 %v1466_v54, %v1382_v22 }
 0x128   : > { %v1603_v58 = vpop.f32.mrf.mxu0 }
 0x129   : > { %v1620_v60 = vadd.f32 %v1601_v4, %v1485_v59 }
 0x12b   : > { %v2564_v18 = vpop.eup %2563  ;;  %v3186_v35 = vadd.f32 %v3129_v10, %v1620_v60 }
 0x12c   : > { %v1365_v56 = vpop.f32.mrf.mxu2  ;;  %1876 = vrot.lane.b32.xlu2 %v2564_v18, %s2658_s10 }
 0x12d   : > { %2565 = vtanh.f32 %v3186_v35  ;;  %v1383_v2 = vadd.f32 %v1365_v56, %v1248_v39  ;;  %v1468_v43 = vpop.f32.mrf.mxu3  ;;  %v2476_v18 = vmul.f32 -1.442695, %v3186_v35 }
 0x12f   : > { %v1486_v63 = vadd.f32 %v1468_v43, %v1383_v2 }
 0x131   : > { %v1621_v0 = vadd.f32 %v1603_v58, %v1486_v63 }
 0x133   : > { %v2566_v29 = vpop.eup %2565  ;;  %v3197_v5 = vadd.f32 %v3129_v10, %v1621_v0  ;;  %v2470_v10 = vmul.f32 -1.442695, %v3132_v62 }
 0x134   : > { %1818 = vrot.lane.b32.xlu2 %v1650_v3, %s2658_s10  ;;  %1878 = vrot.lane.b32.xlu0 %v2566_v29, %s2658_s10 }
 0x135   : > { %2567 = vtanh.f32 %v3197_v5 }
 0x136   : > { %2569 = vpow2.f32 %v2470_v10 }
 0x137   : > { %2571 = vpow2.f32 %v2471_v42 }
 0x13b   : > { %v2568_v26 = vpop.eup %2567 }
 0x13c   : > { %1824 = vrot.lane.b32.xlu2 %v1653_v6, %s2658_s10  ;;  %1880 = vrot.lane.b32.xlu1 %v2568_v26, %s2658_s10  ;;  %v2570_v11 = vpop.eup %2569 }
 0x13d   : > { %1820 = vrot.lane.b32.xlu0 %v1651_v7, %s2658_s10  ;;  %v1682_v37 = vadd.f32 1.0, %v2570_v11  ;;  %v2572_v21 = vpop.eup %2571 }
 0x13e   : > { %v1683_v62 = vadd.f32 1.0, %v2572_v21 }
 0x13f   : > { %2573 = vrcp.f32 %v1682_v37  ;;  %v1701_v30 = vand.u32 2147483648, %v1682_v37  ;;  %vm1695_vm3 = vweird.f32 %v1682_v37  ;;  %v1699_v31 = vand.u32 2147483647, %v1682_v37 }
 0x140   : > { %2575 = vpow2.f32 %v2472_v13  ;;  %v1716_v55 = vand.u32 2147483648, %v1683_v62  ;;  %vm1710_vm9 = vweird.f32 %v1683_v62  ;;  %v1714_v39 = vand.u32 2147483647, %v1683_v62 }
 0x141   : > { %2577 = vpow2.f32 %v2474_v61  ;;  %v1702_v53 = vor.u32 1.1754944e-38, %v1701_v30  ;;  %vm1700_vm7 = vcmp.eq.f32.partialorder %v1699_v31, 8.507059e+37 }
 0x142   : > { %2579 = vrcp.f32 %v1683_v62  ;;  %v1717_v0 = vor.u32 1.1754944e-38, %v1716_v55  ;;  %vm1715_vm11 = vcmp.eq.f32.partialorder %v1714_v39, 8.507059e+37 }
 0x143   : > { %2581 = vpow2.f32 %v2473_v41 }
 0x144   : > { %1830 = vrot.lane.b32.xlu2 %v1656_v36, %s2658_s10  ;;  %1822 = vrot.lane.b32.xlu1 %v1652_v38, %s2658_s10  ;;  %2583 = vpow2.f32 %v2475_v25 }
 0x145   : > { %1826 = vrot.lane.b32.xlu0 %v1654_v23, %s2658_s10  ;;  %v2574_v40 = vpop.eup %2573 }
 0x146   : > { %v2576_v14 = vpop.eup %2575  ;;  %v1691_v16 = vmul.f32 %v2574_v40, %v1682_v37  ;;  %vm1696_vm1 = vweird.f32 %v2574_v40 }
 0x147   : > { %v2578_v32 = vpop.eup %2577  ;;  %v3216_v17 = vadd.f32 1.0, %v2576_v14  ;;  %vm1697_vm6 = vmor %vm1695_vm3, %vm1696_vm1 }
 0x148   : > { %v3218_v1 = vadd.f32 1.0, %v2578_v32  ;;  %v1692_v51 = vsub.f32 1.0, %v1691_v16  ;;  %v2580_v20 = vpop.eup %2579 }
 0x149   : > { %2585 = vrcp.f32 %v3216_v17  ;;  %v2582_v24 = vpop.eup %2581  ;;  %v1706_v27 = vmul.f32 %v2580_v20, %v1683_v62  ;;  %vm1711_vm8 = vweird.f32 %v2580_v20  ;;  %v1731_v35 = vand.u32 2147483648, %v3216_v17 }
 0x14a   : > { %2587 = vrcp.f32 %v3218_v1  ;;  %v2584_v12 = vpop.eup %2583  ;;  %v1693_v44 = vmul.f32 %v2574_v40, %v1692_v51  ;;  %v3222_v15 = vadd.f32 1.0, %v2582_v24  ;;  %vm1712_vm10 = vmor %vm1710_vm9, %vm1711_vm8  ;;  %v1761_v23 = vand.u32 2147483648, %v3218_v1 }
 0x14b   : > { %v3224_v28 = vadd.f32 1.0, %v2584_v12  ;;  %v1707_v52 = vsub.f32 1.0, %v1706_v27  ;;  %vm1725_vm14 = vweird.f32 %v3216_v17  ;;  %v1729_v10 = vand.u32 2147483647, %v3216_v17 }
 0x14c   : > { %1828 = vrot.lane.b32.xlu1 %v1655_v8, %s2658_s10  ;;  %v1694_v45 = vadd.f32 %v2574_v40, %v1693_v44  ;;  %2589 = vrcp.f32 %v3222_v15  ;;  %v2477_v8 = vmul.f32 -1.442695, %v3197_v5  ;;  %vm1755_vm15 = vweird.f32 %v3218_v1 }
 0x14d   : > { %1832 = vrot.lane.b32.xlu0 %v1657_v49, %s2658_s10  ;;  %2591 = vrcp.f32 %v3224_v28  ;;  %v1708_v34 = vmul.f32 %v2580_v20, %v1707_v52  ;;  %v1759_v49 = vand.u32 2147483647, %v3218_v1  ;;  %v1732_v21 = vor.u32 1.1754944e-38, %v1731_v35 }
 0x14e   : > { %v1698_v46 = vsel %vm1697_vm6, %v2574_v40, %v1694_v45  ;;  %2593 = vpow2.f32 %v2476_v18  ;;  %v1762_v5 = vor.u32 1.1754944e-38, %v1761_v23  ;;  %vm1730_vm4 = vcmp.eq.f32.partialorder %v1729_v10, 8.507059e+37 }
 0x14f   : > { %v3226_v9 = vpop.eup %2585  ;;  %v3236_v48 = vsel %vm1700_vm7, %v1702_v53, %v1698_v46  ;;  %v1709_v47 = vadd.f32 %v2580_v20, %v1708_v34  ;;  %2595 = vpow2.f32 %v2477_v8  ;;  %vm1760_vm5 = vcmp.eq.f32.partialorder %v1759_v49, 8.507059e+37 }
 0x150   : > { %v3228_v19 = vpop.eup %2587  ;;  %v1721_v33 = vmul.f32 %v3226_v9, %v3216_v17  ;;  %vm1726_vm12 = vweird.f32 %v3226_v9  ;;  %v1776_v51 = vand.u32 2147483648, %v3224_v28  ;;  %vm1740_vm6 = vweird.f32 %v3222_v15 }
 0x151   : > { %v1751_v50 = vmul.f32 %v3228_v19, %v3218_v1  ;;  %v1713_v63 = vsel %vm1712_vm10, %v2580_v20, %v1709_v47  ;;  %vm1756_vm13 = vweird.f32 %v3228_v19  ;;  %vm1727_vm0 = vmor %vm1725_vm14, %vm1726_vm12  ;;  %v1746_v20 = vand.u32 2147483648, %v3222_v15 }
 0x152   : > { %v1722_v22 = vsub.f32 1.0, %v1721_v33  ;;  %v3238_v54 = vpop.eup %2589  ;;  %v3252_v29 = vsel %vm1715_vm11, %v1717_v0, %v1713_v63  ;;  %vm1757_vm2 = vmor %vm1755_vm15, %vm1756_vm13  ;;  %vm1770_vm7 = vweird.f32 %v3224_v28  ;;  %v1774_v24 = vand.u32 2147483647, %v3224_v28 }
 0x153   : > { %v1752_v59 = vsub.f32 1.0, %v1751_v50  ;;  %v3241_v60 = vpop.eup %2591  ;;  %v1736_v2 = vmul.f32 %v3238_v54, %v3222_v15  ;;  %vm1741_vm1 = vweird.f32 %v3238_v54  ;;  %v1744_v44 = vand.u32 2147483647, %v3222_v15 }
 0x154   : > { %v1723_v56 = vmul.f32 %v3226_v9, %v1722_v22  ;;  %v1766_v58 = vmul.f32 %v3241_v60, %v3224_v28  ;;  %v2594_v13 = vpop.eup %2593  ;;  %vm1771_vm3 = vweird.f32 %v3241_v60  ;;  %vm3287_vm8 = vmor %vm1740_vm6, %vm1741_vm1  ;;  %v1777_v52 = vor.u32 1.1754944e-38, %v1776_v51 }
 0x155   : > { %v1753_v43 = vmul.f32 %v3228_v19, %v1752_v59  ;;  %v1737_v7 = vsub.f32 1.0, %v1736_v2  ;;  %v1688_v41 = vadd.f32 1.0, %v2594_v13  ;;  %vm1772_vm9 = vmor %vm1770_vm7, %vm1771_vm3  ;;  %v2596_v27 = vpop.eup %2595  ;;  %vm1775_vm10 = vcmp.eq.f32.partialorder %v1774_v24, 8.507059e+37 }
 0x156   : > { %v1724_v6 = vadd.f32 %v3226_v9, %v1723_v56  ;;  %v1767_v38 = vsub.f32 1.0, %v1766_v58  ;;  %vm1745_vm11 = vcmp.eq.f32.partialorder %v1744_v44, 8.507059e+37  ;;  %v1689_v30 = vadd.f32 1.0, %v2596_v27 }
 0x157   : > { %v1754_v26 = vadd.f32 %v3228_v19, %v1753_v43  ;;  %v1738_v37 = vmul.f32 %v3238_v54, %v1737_v7  ;;  %2597 = vrcp.f32 %v1688_v41  ;;  %vm1785_vm13 = vweird.f32 %v1688_v41 }
 0x158   : > { %v1728_v11 = vsel %vm1727_vm0, %v3226_v9, %v1724_v6  ;;  %v1768_v62 = vmul.f32 %v3241_v60, %v1767_v38  ;;  %2599 = vrcp.f32 %v1689_v30  ;;  %v1789_v55 = vand.u32 2147483647, %v1688_v41 }
 0x159   : > { %v1758_v61 = vsel %vm1757_vm2, %v3228_v19, %v1754_v26  ;;  %v3270_v40 = vsel %vm1730_vm4, %v1732_v21, %v1728_v11  ;;  %v1739_v32 = vadd.f32 %v3238_v54, %v1738_v37  ;;  %v1747_v19 = vor.u32 1.1754944e-38, %v1746_v20 }
 0x15a   : > { %v3272_v25 = vsel %vm1760_vm5, %v1762_v5, %v1758_v61  ;;  %v1769_v1 = vadd.f32 %v3241_v60, %v1768_v62  ;;  %vm1790_vm15 = vcmp.eq.f32.partialorder %v1789_v55, 8.507059e+37  ;;  %v1806_v0 = vand.u32 2147483648, %v1689_v30 }
 0x15b   : > { %v1743_v45 = vsel %vm3287_vm8, %v3238_v54, %v1739_v32  ;;  %vm1800_vm2 = vweird.f32 %v1689_v30  ;;  %v1804_v35 = vand.u32 2147483647, %v1689_v30  ;;  %vm2067_vm1 = vcmask 261120  }
 0x15c   : > { %v1773_v9 = vsel %vm1772_vm9, %v3241_v60, %v1769_v1  ;;  %v3298_v46 = vsel %vm1745_vm11, %v1747_v19, %v1743_v45  ;;  %v1791_v60 = vand.u32 2147483648, %v1688_v41  ;;  %v1807_v6 = vor.u32 1.1754944e-38, %v1806_v0 }
 0x15d   : > { %v3296_v31 = vsel %vm1775_vm10, %v1777_v52, %v1773_v9  ;;  %v2598_v34 = vpop.eup %2597  ;;  %vm1805_vm5 = vcmp.eq.f32.partialorder %v1804_v35, 8.507059e+37  ;;  %vm2026_vm3 = vcmask 257024  }
 0x15e   : > { %v1781_v53 = vmul.f32 %v2598_v34, %v1688_v41  ;;  %v2600_v22 = vpop.eup %2599  ;;  %vm1786_vm12 = vweird.f32 %v2598_v34  ;;  %v1792_v56 = vor.u32 1.1754944e-38, %v1791_v60 }
 0x15f   : > { %vm1787_vm14 = vmor %vm1785_vm13, %vm1786_vm12  ;;  %vm1801_vm0 = vweird.f32 %v2600_v22 }
 0x160   : > { %vm1802_vm4 = vmor %vm1800_vm2, %vm1801_vm0 }
 0x176   : > { %v1867_v57 = vpop.permute.xlu0 %1866 }
 0x177   : > { %v1890_v4 = vmul.f32 %v1867_v57, %v3236_v48  ;;  %v1782_v57 = vsub.f32 1.0, %v1781_v53 }
 0x179   : > { %1906 = vrot.lane.b32.xlu1 %v1890_v4, %s2658_s10  ;;  %v1783_v54 = vmul.f32 %v2598_v34, %v1782_v57  ;;  %v1796_v4 = vmul.f32 %v2600_v22, %v1689_v30 }
 0x17b   : > { %v1784_v59 = vadd.f32 %v2598_v34, %v1783_v54  ;;  %v1797_v47 = vsub.f32 1.0, %v1796_v4 }
 0x17d   : > { %v1788_v18 = vsel %vm1787_vm14, %v2598_v34, %v1784_v59  ;;  %v1798_v39 = vmul.f32 %v2600_v22, %v1797_v47 }
 0x17e   : > { %v1869_v3 = vpop.permute.xlu0 %1868  ;;  %v1875_v42 = vpop.permute.xlu2 %1874  ;;  %v3304_v2 = vsel %vm1790_vm15, %v1792_v56, %v1788_v18 }
 0x17f   : > { %v1891_v36 = vmul.f32 %v1869_v3, %v3252_v29  ;;  %v1894_v16 = vmul.f32 %v1875_v42, %v3272_v25  ;;  %v1799_v58 = vadd.f32 %v2600_v22, %v1798_v39 }
 0x181   : > { %1908 = vrot.lane.b32.xlu2 %v1891_v36, %s2658_s10  ;;  %v1803_v3 = vsel %vm1802_vm4, %v2600_v22, %v1799_v58 }
 0x182   : > { %v3308_v26 = vsel %vm1805_vm5, %v1807_v6, %v1803_v3 }
 0x186   : > { %v1871_v14 = vpop.permute.xlu1 %1870  ;;  %v1877_v28 = vpop.permute.xlu2 %1876 }
 0x187   : > { %v1892_v17 = vmul.f32 %v1871_v14, %v3270_v40  ;;  %v1895_v15 = vmul.f32 %v1877_v28, %v3296_v31 }
 0x189   : > { %1910 = vrot.lane.b32.xlu0 %v1892_v17, %s2658_s10  ;;  %1914 = vrot.lane.b32.xlu2 %v1894_v16, %s2658_s10 }
 0x18e   : > { %v1873_v33 = vpop.permute.xlu1 %1872  ;;  %v1819_v38 = vpop.permute.xlu2 %1818 }
 0x18f   : > { %v1893_v50 = vmul.f32 %v1873_v33, %v3298_v46  ;;  %v1842_v14 = vmul.f32 %v1819_v38, %v3236_v48 }
 0x191   : > { %1912 = vrot.lane.b32.xlu1 %v1893_v50, %s2658_s10  ;;  %1916 = vrot.lane.b32.xlu0 %v1895_v15, %s2658_s10 }
 0x196   : > { %v1825_v23 = vpop.permute.xlu2 %1824 }
 0x197   : > { %v1845_v44 = vmul.f32 %v1825_v23, %v3298_v46 }
 0x19e   : > { %v1831_v10 = vpop.permute.xlu2 %1830 }
 0x19f   : > { %v1848_v57 = vmul.f32 %v1831_v10, %v3304_v2 }
 0x1a6   : > { %v1879_v43 = vpop.permute.xlu0 %1878 }
 0x1a7   : > { %v1896_v63 = vmul.f32 %v1879_v43, %v3304_v2 }
 0x1a9   : > { %1918 = vrot.lane.b32.xlu1 %v1896_v63, %s2658_s10 }
 0x1ae   : > { %v1881_v7 = vpop.permute.xlu1 %1880 }
 0x1af   : > { %v1897_v36 = vmul.f32 %v1881_v7, %v3308_v26  ;;  %v1821_v8 = vpop.permute.xlu0 %1820 }
 0x1b0   : > { %v1843_v42 = vmul.f32 %v1821_v8, %v3252_v29 }
 0x1b1   : > { %1920 = vrot.lane.b32.xlu2 %v1897_v36, %s2658_s10 }
 0x1b6   : > { %v1823_v49 = vpop.permute.xlu1 %1822 }
 0x1b7   : > { %v1827_v13 = vpop.permute.xlu0 %1826  ;;  %v1844_v20 = vmul.f32 %v1823_v49, %v3270_v40 }
 0x1b8   : > { %v1846_v61 = vmul.f32 %v1827_v13, %v3272_v25 }
 0x1be   : > { %v1829_v21 = vpop.permute.xlu1 %1828 }
 0x1bf   : > { %v1833_v1 = vpop.permute.xlu0 %1832  ;;  %v1847_v27 = vmul.f32 %v1829_v21, %v3296_v31 }
 0x1c0   : > { %v1849_v30 = vmul.f32 %v1833_v1, %v3308_v26 }
 0x1db   : > { %v1909_v11 = vpop.permute.xlu2 %1908 }
 0x1dc   : > { %v1931_v37 = vadd.f32 %v1909_v11, %v1843_v42 }
 0x1de   : > { %2601 = vtanh.f32 %v1931_v37 }
 0x1e3   : > { %v1915_v62 = vpop.permute.xlu2 %1914 }
 0x1e4   : > { %v2602_v5 = vpop.eup %2601  ;;  %v1934_v41 = vadd.f32 %v1915_v62, %v1846_v61 }
 0x1e5   : > { %1956 = vrot.lane.b32.xlu1 %v2602_v5, %s2658_s10 }
 0x1e6   : > { %2603 = vtanh.f32 %v1934_v41 }
 0x1eb   : > { %v1907_v32 = vpop.permute.xlu1 %1906 }
 0x1ec   : > { %v2604_v16 = vpop.eup %2603  ;;  %v1930_v17 = vadd.f32 %v1907_v32, %v1842_v14 }
 0x1ed   : > { %1962 = vrot.lane.b32.xlu1 %v2604_v16, %s2658_s10 }
 0x1ee   : > { %2605 = vtanh.f32 %v1930_v17 }
 0x1f4   : > { %v2606_v51 = vpop.eup %2605 }
 0x1f5   : > { %1954 = vrot.lane.b32.xlu0 %v2606_v51, %s2658_s10 }
 0x1fb   : > { %v1911_v24 = vpop.permute.xlu0 %1910 }
 0x1fc   : > { %v1932_v12 = vadd.f32 %v1911_v24, %v1844_v20 }
 0x1fe   : > { %2607 = vtanh.f32 %v1932_v12 }
 0x203   : > { %v1913_v9 = vpop.permute.xlu1 %1912  ;;  %v1917_v45 = vpop.permute.xlu0 %1916 }
 0x204   : > { %v2608_v28 = vpop.eup %2607  ;;  %v1933_v52 = vadd.f32 %v1913_v9, %v1845_v44  ;;  %v3321_v19 = vadd.f32 %v1917_v45, %v1847_v27 }
 0x205   : > { %1958 = vrot.lane.b32.xlu2 %v2608_v28, %s2658_s10 }
 0x206   : > { %2609 = vtanh.f32 %v1933_v52 }
 0x207   : > { %2611 = vtanh.f32 %v3321_v19 }
 0x20b   : > { %v1921_v33 = vpop.permute.xlu2 %1920 }
 0x20c   : > { %v2610_v15 = vpop.eup %2609  ;;  %v3326_v50 = vadd.f32 %v1921_v33, %v1849_v30 }
 0x20d   : > { %v2612_v34 = vpop.eup %2611  ;;  %1960 = vrot.lane.b32.xlu0 %v2610_v15, %s2658_s10 }
 0x20e   : > { %2613 = vtanh.f32 %v3326_v50  ;;  %1964 = vrot.lane.b32.xlu2 %v2612_v34, %s2658_s10 }
 0x214   : > { %v2614_v53 = vpop.eup %2613 }
 0x215   : > { %1968 = vrot.lane.b32.xlu1 %v2614_v53, %s2658_s10 }
 0x216   : > { %2045 = vrot.lane.b32.xlu2 %v1931_v37, %s2659_s16 }
 0x21b   : > { %v1919_v22 = vpop.permute.xlu1 %1918 }
 0x21c   : > { %v1936_v54 = vadd.f32 %v1919_v22, %v1848_v57 }
 0x21d   : > { %2043 = vrot.lane.b32.xlu1 %v1930_v17, %s2659_s16 }
 0x21e   : > { %2615 = vtanh.f32 %v1936_v54  ;;  %2051 = vrot.lane.b32.xlu2 %v1934_v41, %s2659_s16 }
 0x224   : > { %v2616_v4 = vpop.eup %2615 }
 0x225   : > { %1966 = vrot.lane.b32.xlu0 %v2616_v4, %s2658_s10  ;;  %2049 = vrot.lane.b32.xlu1 %v1933_v52, %s2659_s16 }
 0x22d   : > { %2047 = vrot.lane.b32.xlu0 %v1932_v12, %s2659_s16 }
 0x257   : > { %v1957_v59 = vpop.permute.xlu1 %1956 }
 0x258   : > { %v1979_v47 = vmul.f32 %v1957_v59, %v3252_v29 }
 0x25a   : > { %v1987_v60 = vpack.c.bf16 %v1979_v47, %v1979_v47 }
 0x25c   : > { %2004 = vrot.lane.b32.xlu0 %v1987_v60, %s2660_s17 }
 0x25f   : > { %v1959_v55 = vpop.permute.xlu2 %1958  ;;  %v1963_v18 = vpop.permute.xlu1 %1962 }
 0x260   : > { %v1980_v39 = vmul.f32 %v1959_v55, %v3270_v40  ;;  %v1982_v56 = vmul.f32 %v1963_v18, %v3272_v25 }
 0x262   : > { %v1988_v43 = vpack.c.bf16 %v1980_v39, %v1980_v39  ;;  %v1990_v63 = vpack.c.bf16 %v1982_v56, %v1982_v56 }
 0x264   : > { %2006 = vrot.lane.b32.xlu1 %v1988_v43, %s2660_s17  ;;  %2010 = vrot.lane.b32.xlu0 %v1990_v63, %s2660_s17 }
 0x267   : > { %v1955_v58 = vpop.permute.xlu0 %1954 }
 0x268   : > { %v1978_v29 = vmul.f32 %v1955_v58, %v3236_v48  ;;  %v1965_v0 = vpop.permute.xlu2 %1964 }
 0x269   : > { %v1983_v35 = vmul.f32 %v1965_v0, %v3296_v31 }
 0x26a   : > { %v1986_v3 = vpack.c.bf16 %v1978_v29, %v1978_v29 }
 0x26b   : > { %v1991_v6 = vpack.c.bf16 %v1983_v35, %v1983_v35 }
 0x26c   : > { %2002 = vrot.lane.b32.xlu2 %v1986_v3, %s2660_s17 }
 0x26d   : > { %2012 = vrot.lane.b32.xlu1 %v1991_v6, %s2660_s17 }
 0x270   : > { %v2046_v48 = vpop.permute.xlu2 %2045 }
 0x271   : > { %2069 = vst.msk [vmem:[%s3354_s28 + $0x8] sm:$0xff] %vm2067_vm1, %v2046_v48 }
 0x275   : > { %2055 = vrot.lane.b32.xlu1 %v1936_v54, %s2659_s16 }
 0x278   : > { %v2052_v40 = vpop.permute.xlu2 %2051 }
 0x279   : > { %2072 = vst.msk [vmem:[%s3354_s28 + $0x20] sm:$0xff] %vm2067_vm1, %v2052_v40 }
 0x27f   : > { %v1961_v25 = vpop.permute.xlu0 %1960 }
 0x280   : > { %v1981_v31 = vmul.f32 %v1961_v25, %v3298_v46 }
 0x282   : > { %v1989_v7 = vpack.c.bf16 %v1981_v31, %v1981_v31 }
 0x284   : > { %2008 = vrot.lane.b32.xlu2 %v1989_v7, %s2660_s17 }
 0x287   : > { %v1969_v36 = vpop.permute.xlu1 %1968 }
 0x288   : > { %v1985_v38 = vmul.f32 %v1969_v36, %v3308_v26 }
 0x28a   : > { %v1993_v23 = vpack.c.bf16 %v1985_v38, %v1985_v38 }
 0x28c   : > { %2016 = vrot.lane.b32.xlu0 %v1993_v23, %s2660_s17 }
 0x28f   : > { %v2044_v10 = vpop.permute.xlu1 %2043 }
 0x290   : > { %2068 = vst.msk [vmem:[%s3354_s28] sm:$0xff] %vm2067_vm1, %v2044_v10 }
 0x294   : > { %2053 = vrot.lane.b32.xlu0 %v3321_v19, %s2659_s16 }
 0x297   : > { %v1967_v8 = vpop.permute.xlu0 %1966  ;;  %v2050_v49 = vpop.permute.xlu1 %2049 }
 0x298   : > { %v1984_v46 = vmul.f32 %v1967_v8, %v3304_v2  ;;  %2071 = vst.msk [vmem:[%s3354_s28 + $0x18] sm:$0xff] %vm2067_vm1, %v2050_v49 }
 0x29a   : > { %v1992_v42 = vpack.c.bf16 %v1984_v46, %v1984_v46 }
 0x29c   : > { %2014 = vrot.lane.b32.xlu2 %v1992_v42, %s2660_s17 }
 0x29f   : > { %v2048_v11 = vpop.permute.xlu0 %2047 }
 0x2a0   : > { %2070 = vst.msk [vmem:[%s3354_s28 + $0x10] sm:$0xff] %vm2067_vm1, %v2048_v11 }
 0x2a4   : > { %2057 = vrot.lane.b32.xlu2 %v3326_v50, %s2659_s16 }
 0x2c6   : > { %v2003_v26 = vpop.permute.xlu2 %2002 }
 0x2c7   : > { %2027 = vst.msk [vmem:[%s294_s7] sm:$0xf] %vm2026_vm3, %v2003_v26 }
 0x2ce   : > { %v2005_v2 = vpop.permute.xlu0 %2004 }
 0x2cf   : > { %2028 = vst.msk [vmem:[%s294_s7 + $0x4] sm:$0xf] %vm2026_vm3, %v2005_v2 }
 0x2d6   : > { %v2011_v37 = vpop.permute.xlu0 %2010  ;;  %v2007_v13 = vpop.permute.xlu1 %2006 }
 0x2d7   : > { %2031 = vst.msk [vmem:[%s294_s7 + $0x10] sm:$0xf] %vm2026_vm3, %v2011_v37 }
 0x2d8   : > { %2029 = vst.msk [vmem:[%s294_s7 + $0x8] sm:$0xf] %vm2026_vm3, %v2007_v13 }
 0x2de   : > { %v2009_v61 = vpop.permute.xlu2 %2008 }
 0x2df   : > { %2030 = vst.msk [vmem:[%s294_s7 + $0xc] sm:$0xf] %vm2026_vm3, %v2009_v61  ;;  %v2013_v21 = vpop.permute.xlu1 %2012 }
 0x2e0   : > { %2032 = vst.msk [vmem:[%s294_s7 + $0x14] sm:$0xf] %vm2026_vm3, %v2013_v21 }
 0x2e7   : > { %v2056_v62 = vpop.permute.xlu1 %2055 }
 0x2e8   : > { %2074 = vst.msk [vmem:[%s3354_s28 + $0x30] sm:$0xff] %vm2067_vm1, %v2056_v62 }
 0x2f6   : > { %v2015_v5 = vpop.permute.xlu2 %2014 }
 0x2f7   : > { %2033 = vst.msk [vmem:[%s294_s7 + $0x18] sm:$0xf] %vm2026_vm3, %v2015_v5 }
 0x2fe   : > { %v2058_v41 = vpop.permute.xlu2 %2057  ;;  %v2017_v14 = vpop.permute.xlu0 %2016 }
 0x2ff   : > { %2075 = vst.msk [vmem:[%s3354_s28 + $0x38] sm:$0xff] %vm2067_vm1, %v2058_v41 }
 0x300   : > { %2034 = vst.msk [vmem:[%s294_s7 + $0x1c] sm:$0xf] %vm2026_vm3, %v2017_v14 }
 0x306   : > { %v2054_v32 = vpop.permute.xlu0 %2053 }
 0x307   : > { %2073 = vst.msk [vmem:[%s3354_s28 + $0x28] sm:$0xff] %vm2067_vm1, %v2054_v32 }
 0x308 PF: > { %s16_s22 = sadd.s32 1, %s2655_s22   ;;  %s3436_s18 = smov %s2647_s20 }
 0x309   : > { %p13_p7 = scmp.ge.s32.totalorder %s16_s22, 10   ;;  %s3437_s19 = smov %s2651_s21 }
 0x30a   : > { %s3438_s20 = smov %s3441_s23  ;;  %s3439_s21 = smov %s3445_s24 }
 0x30b   :  { %15 = sbr.rel (!%p13_p7) target bundleno = 3 (0x3), region = 98 }

</bundles_post_ra>
